<compile_context>
chip_gen: v6e
topology: v6e:2x2x1
jax: 0.10.0
libtpu: 0.0.40
codegen_flags: <defaults>
</compile_context>

<pallas_src>
import jax
import jax.numpy as jnp
from jax import lax
from jax.experimental import pallas as pl
from jax.experimental.pallas import tpu as pltpu

EPS = 1e-5


# ----------------------------------------------------------------------------
# In-kernel helpers
# ----------------------------------------------------------------------------
def _channel_sums(v):
    """Per-channel sum and sum-of-squares of v (H, W, C) -> two (1, 1, C) f32."""
    C = v.shape[-1]
    s = jnp.sum(jnp.sum(v, axis=0), axis=0, keepdims=True)       # (1, C)
    q = jnp.sum(jnp.sum(v * v, axis=0), axis=0, keepdims=True)   # (1, C)
    return s.reshape(1, 1, C), q.reshape(1, 1, C)


def _reflect_border(xp_ref, H, W):
    """Fill the 1-px reflect border of xp_ref; interior [1:H+1,1:W+1] is set."""
    xp_ref[0, 1:W + 1, :] = xp_ref[2, 1:W + 1, :]
    xp_ref[H + 1, 1:W + 1, :] = xp_ref[H - 1, 1:W + 1, :]
    xp_ref[:, 0, :] = xp_ref[:, 2, :]
    xp_ref[:, W + 1, :] = xp_ref[:, W - 1, :]


def _im2col3x3(xp_ref, H, W):
    """(H, W, 9*Ct) bf16 im2col of the padded scratch: lane concatenate of the
    nine shifted ref windows; tap order (kh, kw) row-major matches the folded
    weight layout w.reshape(9*Ct, Cout)."""
    return jnp.concatenate(
        [xp_ref[kh:kh + H, kw:kw + W, :] for kh in range(3) for kw in range(3)],
        axis=-1)


# ----------------------------------------------------------------------------
# Kernel A: ConvTranspose2d(k=4, s=2, p=1) via 4-phase sub-pixel decomposition
#           (dj phase folded into the MXU N dim) + per-channel BN statistics.
# ----------------------------------------------------------------------------
def _up_kernel(x_ref, wf_ref, b_ref, o_ref, ssum_ref, ssq_ref, xp_ref):
    # x_ref : (1, H, W, Cin)         wf_ref: (2, 6*Cin, 2*Co) bf16
    # o_ref : (1, H, 2, W, 2*Co)     row phase in dim 2, column phase in lanes
    _, H, W, Cin = x_ref.shape
    co2 = b_ref.shape[-1]
    bf = jnp.bfloat16

    # zero-pad-by-1 input in VMEM; only the 1-px border is memset.
    xp_ref[1:H + 1, 1:W + 1, :] = x_ref[0].astype(bf)
    zrow = jnp.zeros((W + 2, Cin), bf)
    xp_ref[0, :, :] = zrow
    xp_ref[H + 1, :, :] = zrow
    zcol = jnp.zeros((H + 2, Cin), bf)
    xp_ref[:, 0, :] = zcol
    xp_ref[:, W + 1, :] = zcol

    bias = b_ref[...]                                            # (1, 1, 2*Co)
    ssum = jnp.zeros((1, 1, co2), jnp.float32)
    ssq = jnp.zeros((1, 1, co2), jnp.float32)
    for di in (0, 1):                                            # output row phase
        # 6-tap im2col (a in {0,1} rows, c in {0,1,2} cols); column phase dj
        # is folded into the matmul N dimension by the weight layout.
        xcol = jnp.concatenate(
            [xp_ref[di + a:di + a + H, c:c + W, :]
             for a in (0, 1) for c in (0, 1, 2)], axis=-1)       # (H, W, 6*Cin)
        ys = lax.dot_general(
            xcol, wf_ref[di],
            dimension_numbers=(((2,), (0,)), ((), ())),
            preferred_element_type=jnp.float32) + bias           # (H, W, 2*Co)
        o_ref[0, :, di, :, :] = ys.astype(o_ref.dtype)
        s, q = _channel_sums(ys)
        ssum = ssum + s
        ssq = ssq + q
    ssum_ref[...] = ssum
    ssq_ref[...] = ssq


def _fold_up_weight(w):
    """w: (4, 4, Cin, Co) HWIO taps of the (spatially flipped) stride-1 conv
    equivalent of ConvTranspose2d(k=4, s=2, p=1).

    Returns (2, 6*Cin, 2*Co): for output-row phase di, rows are the 6 im2col
    taps (a, c) and columns are [dj=0 | dj=1] output channels; taps that do
    not contribute to a column phase are zero."""
    Cin, Co = w.shape[2], w.shape[3]
    z = jnp.zeros((Cin, Co), w.dtype)
    per_di = []
    for di in (0, 1):
        rows = []
        for a in (0, 1):
            for c in (0, 1, 2):
                w0 = w[2 * a + di, 2 * c] if c <= 1 else z       # dj=0, b=c
                w1 = w[2 * a + di, 2 * c - 1] if c >= 1 else z   # dj=1, b=c-1
                rows.append(jnp.concatenate([w0, w1], axis=-1))  # (Cin, 2*Co)
        per_di.append(jnp.concatenate(rows, axis=0))             # (6*Cin, 2*Co)
    return jnp.stack(per_di, axis=0)                             # (2, 6*Cin, 2*Co)


def up_transposed_conv(x, w_up_hwio, b_up):
    """Raw ConvTranspose2d output (B, 2H, 2W, Co) + per-channel sum / sumsq."""
    B, H, W, Cin = x.shape
    Co = w_up_hwio.shape[-1]
    wf = _fold_up_weight(w_up_hwio).astype(jnp.bfloat16)
    bias2 = jnp.tile(b_up, 2).reshape(1, 1, 2 * Co).astype(jnp.float32)

    U, ps, pq = pl.pallas_call(
        _up_kernel,
        out_shape=(jax.ShapeDtypeStruct((B, H, 2, W, 2 * Co), x.dtype),
                   jax.ShapeDtypeStruct((B, 1, 2 * Co), jnp.float32),
                   jax.ShapeDtypeStruct((B, 1, 2 * Co), jnp.float32)),
        grid=(B,),
        in_specs=[
            pl.BlockSpec((1, H, W, Cin), lambda b: (b, 0, 0, 0)),
            pl.BlockSpec((2, 6 * Cin, 2 * Co), lambda b: (0, 0, 0)),
            pl.BlockSpec((1, 1, 2 * Co), lambda b: (0, 0, 0)),
        ],
        out_specs=(
            pl.BlockSpec((1, H, 2, W, 2 * Co), lambda b: (b, 0, 0, 0, 0)),
            pl.BlockSpec((1, 1, 2 * Co), lambda b: (b, 0, 0)),
            pl.BlockSpec((1, 1, 2 * Co), lambda b: (b, 0, 0)),
        ),
        scratch_shapes=[pltpu.VMEM((H + 2, W + 2, Cin), jnp.bfloat16)],
        compiler_params=pltpu.CompilerParams(dimension_semantics=("parallel",)),
    )(x, wf, bias2)

    # (B, H, 2, W, 2*Co) -> (B, 2H, 2W, Co) is a pure contiguous reshape (free).
    up = U.reshape(B, 2 * H, 2 * W, Co)
    ssum = jnp.sum(ps, axis=(0, 1))
    ssq = jnp.sum(pq, axis=(0, 1))
    return up, ssum[:Co] + ssum[Co:], ssq[:Co] + ssq[Co:]


# ----------------------------------------------------------------------------
# Kernels B / C: reflect-pad 3x3 conv (one bf16 im2col matmul, K = 9*Cin) with
#                BN+ReLU applied on load, optional in-VMEM concat with `skip`,
#                emitting BN stats of the raw output.
# ----------------------------------------------------------------------------
def _conv1_kernel(up_ref, skip_ref, scale_ref, shift_ref, wf_ref, b_ref,
                  o_ref, ssum_ref, ssq_ref, xp_ref):
    _, H, W, _ = up_ref.shape
    bf = jnp.bfloat16
    u = jnp.maximum(up_ref[0].astype(jnp.float32) * scale_ref[...]
                    + shift_ref[...], 0.0).astype(bf)
    # channel concat with skip written straight into the padded scratch
    xp_ref[1:H + 1, 1:W + 1, :] = jnp.concatenate(
        [u, skip_ref[0].astype(bf)], axis=-1)
    _reflect_border(xp_ref, H, W)
    c = lax.dot_general(
        _im2col3x3(xp_ref, H, W), wf_ref[...],
        dimension_numbers=(((2,), (0,)), ((), ())),
        preferred_element_type=jnp.float32) + b_ref[...]
    o_ref[0] = c.astype(o_ref.dtype)
    ssum_ref[...], ssq_ref[...] = _channel_sums(c)


def _conv2_kernel(c1_ref, scale_ref, shift_ref, wf_ref, b_ref,
                  o_ref, ssum_ref, ssq_ref, xp_ref):
    _, H, W, _ = c1_ref.shape
    bf = jnp.bfloat16
    o1 = jnp.maximum(c1_ref[0].astype(jnp.float32) * scale_ref[...]
                     + shift_ref[...], 0.0)
    xp_ref[1:H + 1, 1:W + 1, :] = o1.astype(bf)
    _reflect_border(xp_ref, H, W)
    c = lax.dot_general(
        _im2col3x3(xp_ref, H, W), wf_ref[...],
        dimension_numbers=(((2,), (0,)), ((), ())),
        preferred_element_type=jnp.float32) + b_ref[...]
    o_ref[0] = c.astype(o_ref.dtype)
    ssum_ref[...], ssq_ref[...] = _channel_sums(c)


def conv3x3_fused(x, scale, shift, w_hwio, bias, skip=None):
    """Reflect-pad 3x3 conv of ReLU(scale*x+shift) [concat skip], + BN stats."""
    B, H, W, Cx = x.shape
    Ctot, Cout = w_hwio.shape[2], w_hwio.shape[3]
    # fold (kh, kw, cin) into the contraction dim -> (9*Ctot, Cout), bf16 MXU
    wf = w_hwio.reshape(9 * Ctot, Cout).astype(jnp.bfloat16)
    b2 = bias.reshape(1, 1, Cout).astype(jnp.float32)
    sc = scale.reshape(1, 1, Cx).astype(jnp.float32)
    sh = shift.reshape(1, 1, Cx).astype(jnp.float32)

    def vec(c):
        return pl.BlockSpec((1, 1, c), lambda b: (0, 0, 0))

    stat_spec = pl.BlockSpec((1, 1, Cout), lambda b: (b, 0, 0))
    out_shapes = (jax.ShapeDtypeStruct((B, H, W, Cout), x.dtype),
                  jax.ShapeDtypeStruct((B, 1, Cout), jnp.float32),
                  jax.ShapeDtypeStruct((B, 1, Cout), jnp.float32))
    out_specs = (pl.BlockSpec((1, H, W, Cout), lambda b: (b, 0, 0, 0)),
                 stat_spec, stat_spec)
    w_spec = pl.BlockSpec((9 * Ctot, Cout), lambda b: (0, 0))
    scratch = [pltpu.VMEM((H + 2, W + 2, Ctot), jnp.bfloat16)]
    cp = pltpu.CompilerParams(dimension_semantics=("parallel",))

    if skip is None:
        c, ps, pq = pl.pallas_call(
            _conv2_kernel, out_shape=out_shapes, grid=(B,),
            in_specs=[pl.BlockSpec((1, H, W, Cx), lambda b: (b, 0, 0, 0)),
                      vec(Cx), vec(Cx), w_spec, vec(Cout)],
            out_specs=out_specs, scratch_shapes=scratch, compiler_params=cp,
        )(x, sc, sh, wf, b2)
    else:
        Cs = skip.shape[-1]
        c, ps, pq = pl.pallas_call(
            _conv1_kernel, out_shape=out_shapes, grid=(B,),
            in_specs=[pl.BlockSpec((1, H, W, Cx), lambda b: (b, 0, 0, 0)),
                      pl.BlockSpec((1, H, W, Cs), lambda b: (b, 0, 0, 0)),
                      vec(Cx), vec(Cx), w_spec, vec(Cout)],
            out_specs=out_specs, scratch_shapes=scratch, compiler_params=cp,
        )(x, skip, sc, sh, wf, b2)
    return c, jnp.sum(ps, axis=(0, 1)), jnp.sum(pq, axis=(0, 1))


# ----------------------------------------------------------------------------
# Kernel D: final BN+ReLU(+residual), lane-dense (B*H, W*C) layout.
# ----------------------------------------------------------------------------
def _final_kernel(c1_ref, c2_ref, s1_ref, t1_ref, s2_ref, t2_ref, o_ref):
    a = jnp.maximum(c1_ref[...].astype(jnp.float32) * s1_ref[...] + t1_ref[...], 0.0)
    b = jnp.maximum(c2_ref[...].astype(jnp.float32) * s2_ref[...] + t2_ref[...], 0.0)
    o_ref[...] = (a + b).astype(o_ref.dtype)


def bn_relu_residual(c1, c2, s1, t1, s2, t2):
    """out = relu(c1*s1+t1) + relu(c2*s2+t2)  (i.e. o1 + o2)."""
    B, H, W, C = c1.shape
    M, N = B * H, W * C
    c1f = c1.reshape(M, N)                 # contiguous, free
    c2f = c2.reshape(M, N)

    def tile(v):
        return jnp.tile(v.astype(jnp.float32), W).reshape(1, N)

    # 3 large f32 streams (c1, c2, out), each double-buffered by the pipeline;
    # keep the footprint comfortably under v5e's 16 MiB default scoped VMEM.
    budget = 10 << 20
    per_row = N * 4 * 3 * 2
    TM = M if M * per_row <= budget else max(8, ((budget // per_row) // 8) * 8)
    TM = min(TM, M)
    grid = (pl.cdiv(M, TM),)
    row = pl.BlockSpec((TM, N), lambda i: (i, 0))
    vec = pl.BlockSpec((1, N), lambda i: (0, 0))
    out = pl.pallas_call(
        _final_kernel,
        out_shape=jax.ShapeDtypeStruct((M, N), c1.dtype),
        grid=grid,
        in_specs=[row, row, vec, vec, vec, vec],
        out_specs=row,
        compiler_params=pltpu.CompilerParams(dimension_semantics=("parallel",)),
    )(c1f, c2f, tile(s1), tile(t1), tile(s2), tile(t2))
    return out.reshape(B, H, W, C)


# ----------------------------------------------------------------------------
# Block forward (glue in tiny plain-JAX ops; all heavy work in Pallas)
# ----------------------------------------------------------------------------
def _bn_affine(ssum, ssq, count, gamma, beta):
    mean = ssum / count
    var = ssq / count - mean * mean            # biased variance (PyTorch BN train)
    inv = gamma * lax.rsqrt(var + EPS)
    return inv, beta - mean * inv


def upconv_block_forward(x_nchw, skip_nchw, P):
    x = jnp.transpose(x_nchw, (0, 2, 3, 1))      # NCHW -> NHWC
    skip = jnp.transpose(skip_nchw, (0, 2, 3, 1))
    B, H, W, _ = x.shape
    n_out = B * (2 * H) * (2 * W)

    # --- up: transposed conv (raw) + its BN stats, single pass ---------------
    up, s_up, q_up = up_transposed_conv(x, P["w_up"], P["b_up"])
    sc_up, sh_up = _bn_affine(s_up, q_up, n_out, P["g_up"], P["be_up"])

    # --- conv1: BN+ReLU(up), concat(skip), reflect pad all fused -------------
    c1, s1, q1 = conv3x3_fused(up, sc_up, sh_up, P["w1"], P["b1"], skip=skip)
    sc1, sh1 = _bn_affine(s1, q1, n_out, P["g1"], P["be1"])

    # --- conv2: BN+ReLU(c1) fused on load ------------------------------------
    c2, s2, q2 = conv3x3_fused(c1, sc1, sh1, P["w2"], P["b2"])
    sc2, sh2 = _bn_affine(s2, q2, n_out, P["g2"], P["be2"])

    # --- out = o1 + o2 (lane-dense elementwise) -------------------------------
    out = bn_relu_residual(c1, c2, sc1, sh1, sc2, sh2)
    return jnp.transpose(out, (0, 3, 1, 2))      # NHWC -> NCHW


# ----------------------------------------------------------------------------
# Pure-JAX reference (for self-check)
# ----------------------------------------------------------------------------
def _ref_bn_relu(x, g, b):
    m = x.mean((0, 1, 2))
    v = ((x - m) ** 2).mean((0, 1, 2))
    return jax.nn.relu((x - m) / jnp.sqrt(v + EPS) * g + b)


def ref_forward(x_nchw, skip_nchw, P, *, k=4, s=2, p=1):
    dn = ("NHWC", "HWIO", "NHWC")
    x = jnp.transpose(x_nchw, (0, 2, 3, 1))
    skip = jnp.transpose(skip_nchw, (0, 2, 3, 1))
    pad = k - 1 - p
    up = jax.lax.conv_general_dilated(
        x, P["w_up"], (1, 1), [(pad, pad), (pad, pad)],
        lhs_dilation=(s, s), dimension_numbers=dn) + P["b_up"]
    up = _ref_bn_relu(up, P["g_up"], P["be_up"])
    cat = jnp.concatenate([up, skip], -1)
    c1 = jax.lax.conv_general_dilated(
        jnp.pad(cat, ((0, 0), (1, 1), (1, 1), (0, 0)), mode="reflect"),
        P["w1"], (1, 1), "VALID", dimension_numbers=dn) + P["b1"]
    o1 = _ref_bn_relu(c1, P["g1"], P["be1"])
    c2 = jax.lax.conv_general_dilated(
        jnp.pad(o1, ((0, 0), (1, 1), (1, 1), (0, 0)), mode="reflect"),
        P["w2"], (1, 1), "VALID", dimension_numbers=dn) + P["b2"]
    o2 = _ref_bn_relu(c2, P["g2"], P["be2"])
    return jnp.transpose(o1 + o2, (0, 3, 1, 2))


# ----------------------------------------------------------------------------
if __name__ == "__main__":
    # UpConvBlock(d_in=32, d_out=16, k=4, s=2, p=1), d_skip defaults to d_out.
    B, d_in, d_out, d_skip = 2, 32, 16, 16
    H = W = 8
    K = 4

    key = jax.random.PRNGKey(0)
    ks = jax.random.split(key, 8)

    # ConvTranspose2d weight, PyTorch layout (d_in, d_out, K, K) -> equivalent
    # stride-1 conv weight in HWIO with spatially flipped taps.
    w_up_pt = 0.05 * jax.random.normal(ks[0], (d_in, d_out, K, K), jnp.float32)
    w_up_hwio = jnp.transpose(w_up_pt, (2, 3, 0, 1))[::-1, ::-1, :, :]
    b_up = 0.05 * jax.random.normal(ks[1], (d_out,), jnp.float32)

    # conv1 / conv2 Conv2d weights, PyTorch layout (out, in, 3, 3) -> HWIO.
    w1_pt = 0.05 * jax.random.normal(ks[2], (d_out, d_out + d_skip, 3, 3), jnp.float32)
    w1 = jnp.transpose(w1_pt, (2, 3, 1, 0))
    b1 = 0.05 * jax.random.normal(ks[3], (d_out,), jnp.float32)
    w2_pt = 0.05 * jax.random.normal(ks[4], (d_out, d_out, 3, 3), jnp.float32)
    w2 = jnp.transpose(w2_pt, (2, 3, 1, 0))
    b2 = 0.05 * jax.random.normal(ks[5], (d_out,), jnp.float32)

    params = dict(
        w_up=w_up_hwio, b_up=b_up,
        g_up=jnp.ones((d_out,), jnp.float32), be_up=jnp.zeros((d_out,), jnp.float32),
        w1=w1, b1=b1,
        g1=jnp.ones((d_out,), jnp.float32), be1=jnp.zeros((d_out,), jnp.float32),
        w2=w2, b2=b2,
        g2=jnp.ones((d_out,), jnp.float32), be2=jnp.zeros((d_out,), jnp.float32),
    )

    x = jax.random.normal(ks[6], (B, d_in, H, W), jnp.float32)
    skip = jax.random.normal(ks[7], (B, d_skip, 2 * H, 2 * W), jnp.float32)

    out = upconv_block_forward(x, skip, params)
    out = jax.block_until_ready(out)
    assert out.shape == (B, d_out, 2 * H, 2 * W), out.shape

    ref = jax.block_until_ready(ref_forward(x, skip, params))
    err = float(jnp.max(jnp.abs(out - ref)))
    # bf16 MXU operands across three chained convs (each followed by batch BN)
    # give a few 1e-3 .. low 1e-2 absolute deviation from the all-f32 reference.
    assert err < 5e-2, f"max abs error vs reference: {err}"

    print("KERNEL_OK")
</pallas_src>

<mosaic_0001>
module attributes {stable_mosaic.version = 11 : i64} {
  func.func @_up_kernel(%arg0: i32, %arg1: memref<1x8x8x32xf32, #tpu.memory_space<vmem>>, %arg2: memref<2x192x32xbf16, #tpu.memory_space<vmem>>, %arg3: memref<1x1x32xf32, #tpu.memory_space<vmem>>, %arg4: memref<1x8x2x8x32xf32, #tpu.memory_space<vmem>>, %arg5: memref<1x1x32xf32, #tpu.memory_space<vmem>>, %arg6: memref<1x1x32xf32, #tpu.memory_space<vmem>>, %arg7: memref<10x10x32xbf16, #tpu.memory_space<vmem>>) attributes {dimension_semantics = [#tpu.dimension_semantics<parallel>], iteration_bounds = array<i64: 2>, scalar_prefetch = 0 : i64, scratch_operands = 1 : i64, tpu.core_type = #tpu.core_type<tc>, window_params = [{transform_indices = @transform_0, window_bounds = array<i64: 1, 8, 8, 32>}, {pipeline_mode = #tpu.pipeline_mode<synchronous>, transform_indices = @transform_1, window_bounds = array<i64: 2, 192, 32>}, {pipeline_mode = #tpu.pipeline_mode<synchronous>, transform_indices = @transform_2, window_bounds = array<i64: 1, 1, 32>}, {transform_indices = @transform_3, window_bounds = array<i64: 1, 8, 2, 8, 32>}, {transform_indices = @transform_4, window_bounds = array<i64: 1, 1, 32>}, {transform_indices = @transform_5, window_bounds = array<i64: 1, 1, 32>}]} {
    %c0 = arith.constant 0 : index
    %c0_0 = arith.constant 0 : index
    %c0_1 = arith.constant 0 : index
    %c0_2 = arith.constant 0 : index
    %0 = vector.load %arg1[%c0, %c0_0, %c0_1, %c0_2] : memref<1x8x8x32xf32, #tpu.memory_space<vmem>>, vector<1x8x8x32xf32>
    %1 = vector.shape_cast %0 : vector<1x8x8x32xf32> to vector<8x8x32xf32>
    %2 = arith.truncf %1 : vector<8x8x32xf32> to vector<8x8x32xbf16>
    %c1 = arith.constant 1 : index
    %c1_3 = arith.constant 1 : index
    %c0_4 = arith.constant 0 : index
    %3 = vector.load %arg7[%c1, %c1_3, %c0_4] : memref<10x10x32xbf16, #tpu.memory_space<vmem>>, vector<8x8x32xbf16>
    tpu.vector_store %arg7[%c1, %c1_3, %c0_4], %2 {strides = array<i32>} : memref<10x10x32xbf16, #tpu.memory_space<vmem>>, vector<8x8x32xbf16>,
    %cst = arith.constant 0.000000e+00 : bf16
    %4 = vector.broadcast %cst : bf16 to vector<10x32xbf16>
    %c0_5 = arith.constant 0 : index
    %c0_6 = arith.constant 0 : index
    %c0_7 = arith.constant 0 : index
    %5 = vector.load %arg7[%c0_5, %c0_6, %c0_7] : memref<10x10x32xbf16, #tpu.memory_space<vmem>>, vector<1x10x32xbf16>
    %6 = vector.shape_cast %5 : vector<1x10x32xbf16> to vector<10x32xbf16>
    %7 = vector.shape_cast %4 : vector<10x32xbf16> to vector<1x10x32xbf16>
    tpu.vector_store %arg7[%c0_5, %c0_6, %c0_7], %7 {strides = array<i32>} : memref<10x10x32xbf16, #tpu.memory_space<vmem>>, vector<1x10x32xbf16>,
    %c9 = arith.constant 9 : index
    %c0_8 = arith.constant 0 : index
    %c0_9 = arith.constant 0 : index
    %8 = vector.load %arg7[%c9, %c0_8, %c0_9] : memref<10x10x32xbf16, #tpu.memory_space<vmem>>, vector<1x10x32xbf16>
    %9 = vector.shape_cast %8 : vector<1x10x32xbf16> to vector<10x32xbf16>
    %10 = vector.shape_cast %4 : vector<10x32xbf16> to vector<1x10x32xbf16>
    tpu.vector_store %arg7[%c9, %c0_8, %c0_9], %10 {strides = array<i32>} : memref<10x10x32xbf16, #tpu.memory_space<vmem>>, vector<1x10x32xbf16>,
    %cst_10 = arith.constant 0.000000e+00 : bf16
    %11 = vector.broadcast %cst_10 : bf16 to vector<10x32xbf16>
    %c0_11 = arith.constant 0 : index
    %c0_12 = arith.constant 0 : index
    %c0_13 = arith.constant 0 : index
    %12 = vector.load %arg7[%c0_11, %c0_12, %c0_13] : memref<10x10x32xbf16, #tpu.memory_space<vmem>>, vector<10x1x32xbf16>
    %13 = vector.shape_cast %12 : vector<10x1x32xbf16> to vector<10x32xbf16>
    %14 = vector.shape_cast %11 : vector<10x32xbf16> to vector<10x1x32xbf16>
    tpu.vector_store %arg7[%c0_11, %c0_12, %c0_13], %14 {strides = array<i32>} : memref<10x10x32xbf16, #tpu.memory_space<vmem>>, vector<10x1x32xbf16>,
    %c0_14 = arith.constant 0 : index
    %c9_15 = arith.constant 9 : index
    %c0_16 = arith.constant 0 : index
    %15 = vector.load %arg7[%c0_14, %c9_15, %c0_16] : memref<10x10x32xbf16, #tpu.memory_space<vmem>>, vector<10x1x32xbf16>
    %16 = vector.shape_cast %15 : vector<10x1x32xbf16> to vector<10x32xbf16>
    %17 = vector.shape_cast %11 : vector<10x32xbf16> to vector<10x1x32xbf16>
    tpu.vector_store %arg7[%c0_14, %c9_15, %c0_16], %17 {strides = array<i32>} : memref<10x10x32xbf16, #tpu.memory_space<vmem>>, vector<10x1x32xbf16>,
    %c0_17 = arith.constant 0 : index
    %c0_18 = arith.constant 0 : index
    %c0_19 = arith.constant 0 : index
    %18 = vector.load %arg3[%c0_17, %c0_18, %c0_19] : memref<1x1x32xf32, #tpu.memory_space<vmem>>, vector<1x1x32xf32>
    %cst_20 = arith.constant 0.000000e+00 : f32
    %19 = vector.broadcast %cst_20 : f32 to vector<1x1x32xf32>
    %cst_21 = arith.constant 0.000000e+00 : f32
    %20 = vector.broadcast %cst_21 : f32 to vector<1x1x32xf32>
    %c0_22 = arith.constant 0 : index
    %c0_23 = arith.constant 0 : index
    %c0_24 = arith.constant 0 : index
    %21 = vector.load %arg7[%c0_22, %c0_23, %c0_24] : memref<10x10x32xbf16, #tpu.memory_space<vmem>>, vector<8x8x32xbf16>
    %c0_25 = arith.constant 0 : index
    %c1_26 = arith.constant 1 : index
    %c0_27 = arith.constant 0 : index
    %22 = vector.load %arg7[%c0_25, %c1_26, %c0_27] : memref<10x10x32xbf16, #tpu.memory_space<vmem>>, vector<8x8x32xbf16>
    %c0_28 = arith.constant 0 : index
    %c2 = arith.constant 2 : index
    %c0_29 = arith.constant 0 : index
    %23 = vector.load %arg7[%c0_28, %c2, %c0_29] : memref<10x10x32xbf16, #tpu.memory_space<vmem>>, vector<8x8x32xbf16>
    %c1_30 = arith.constant 1 : index
    %c0_31 = arith.constant 0 : index
    %c0_32 = arith.constant 0 : index
    %24 = vector.load %arg7[%c1_30, %c0_31, %c0_32] : memref<10x10x32xbf16, #tpu.memory_space<vmem>>, vector<8x8x32xbf16>
    %c1_33 = arith.constant 1 : index
    %c1_34 = arith.constant 1 : index
    %c0_35 = arith.constant 0 : index
    %25 = vector.load %arg7[%c1_33, %c1_34, %c0_35] : memref<10x10x32xbf16, #tpu.memory_space<vmem>>, vector<8x8x32xbf16>
    %c1_36 = arith.constant 1 : index
    %c2_37 = arith.constant 2 : index
    %c0_38 = arith.constant 0 : index
    %26 = vector.load %arg7[%c1_36, %c2_37, %c0_38] : memref<10x10x32xbf16, #tpu.memory_space<vmem>>, vector<8x8x32xbf16>
    %27 = tpu.concatenate %21, %22, %23, %24, %25, %26 in 2 : vector<8x8x32xbf16>, vector<8x8x32xbf16>, vector<8x8x32xbf16>, vector<8x8x32xbf16>, vector<8x8x32xbf16>, vector<8x8x32xbf16> -> vector<8x8x192xbf16>
    %c0_39 = arith.constant 0 : index
    %c0_40 = arith.constant 0 : index
    %c0_41 = arith.constant 0 : index
    %28 = vector.load %arg2[%c0_39, %c0_40, %c0_41] : memref<2x192x32xbf16, #tpu.memory_space<vmem>>, vector<1x192x32xbf16>
    %29 = vector.shape_cast %28 : vector<1x192x32xbf16> to vector<192x32xbf16>
    %cst_42 = arith.constant dense<0.000000e+00> : vector<8x8x32xf32>
    %30 = tpu.matmul %27, %29, %cst_42 {dimension_numbers = #tpu.dot_dimension_numbers<[2], [0], [0, 1], [1], [0, 0, 0, 1, 1, 1], [], []>} : vector<8x8x192xbf16>, vector<192x32xbf16>, vector<8x8x32xf32> -> vector<8x8x32xf32>
    %31 = vector.broadcast %18 : vector<1x1x32xf32> to vector<8x8x32xf32>
    %32 = arith.addf %30, %31 : vector<8x8x32xf32>
    %c0_43 = arith.constant 0 : index
    %c0_44 = arith.constant 0 : index
    %c0_45 = arith.constant 0 : index
    %c0_46 = arith.constant 0 : index
    %c0_47 = arith.constant 0 : index
    %33 = vector.load %arg4[%c0_43, %c0_44, %c0_45, %c0_46, %c0_47] : memref<1x8x2x8x32xf32, #tpu.memory_space<vmem>>, vector<1x8x1x8x32xf32>
    %34 = vector.shape_cast %33 : vector<1x8x1x8x32xf32> to vector<8x8x32xf32>
    %35 = vector.shape_cast %32 : vector<8x8x32xf32> to vector<1x8x1x8x32xf32>
    tpu.vector_store %arg4[%c0_43, %c0_44, %c0_45, %c0_46, %c0_47], %35 {strides = array<i32>} : memref<1x8x2x8x32xf32, #tpu.memory_space<vmem>>, vector<1x8x1x8x32xf32>,
    %cst_48 = arith.constant dense<0.000000e+00> : vector<8x32xf32>
    %36 = vector.multi_reduction <add>, %32, %cst_48 [0] : vector<8x8x32xf32> to vector<8x32xf32>
    %cst_49 = arith.constant dense<0.000000e+00> : vector<32xf32>
    %37 = vector.multi_reduction <add>, %36, %cst_49 [0] : vector<8x32xf32> to vector<32xf32>
    %38 = vector.shape_cast %37 : vector<32xf32> to vector<1x32xf32>
    %39 = arith.mulf %32, %32 : vector<8x8x32xf32>
    %cst_50 = arith.constant dense<0.000000e+00> : vector<8x32xf32>
    %40 = vector.multi_reduction <add>, %39, %cst_50 [0] : vector<8x8x32xf32> to vector<8x32xf32>
    %cst_51 = arith.constant dense<0.000000e+00> : vector<32xf32>
    %41 = vector.multi_reduction <add>, %40, %cst_51 [0] : vector<8x32xf32> to vector<32xf32>
    %42 = vector.shape_cast %41 : vector<32xf32> to vector<1x32xf32>
    %43 = vector.shape_cast %38 : vector<1x32xf32> to vector<1x1x32xf32>
    %44 = vector.shape_cast %42 : vector<1x32xf32> to vector<1x1x32xf32>
    %45 = arith.addf %19, %43 : vector<1x1x32xf32>
    %46 = arith.addf %20, %44 : vector<1x1x32xf32>
    %c1_52 = arith.constant 1 : index
    %c0_53 = arith.constant 0 : index
    %c0_54 = arith.constant 0 : index
    %47 = vector.load %arg7[%c1_52, %c0_53, %c0_54] : memref<10x10x32xbf16, #tpu.memory_space<vmem>>, vector<8x8x32xbf16>
    %c1_55 = arith.constant 1 : index
    %c1_56 = arith.constant 1 : index
    %c0_57 = arith.constant 0 : index
    %48 = vector.load %arg7[%c1_55, %c1_56, %c0_57] : memref<10x10x32xbf16, #tpu.memory_space<vmem>>, vector<8x8x32xbf16>
    %c1_58 = arith.constant 1 : index
    %c2_59 = arith.constant 2 : index
    %c0_60 = arith.constant 0 : index
    %49 = vector.load %arg7[%c1_58, %c2_59, %c0_60] : memref<10x10x32xbf16, #tpu.memory_space<vmem>>, vector<8x8x32xbf16>
    %c2_61 = arith.constant 2 : index
    %c0_62 = arith.constant 0 : index
    %c0_63 = arith.constant 0 : index
    %50 = vector.load %arg7[%c2_61, %c0_62, %c0_63] : memref<10x10x32xbf16, #tpu.memory_space<vmem>>, vector<8x8x32xbf16>
    %c2_64 = arith.constant 2 : index
    %c1_65 = arith.constant 1 : index
    %c0_66 = arith.constant 0 : index
    %51 = vector.load %arg7[%c2_64, %c1_65, %c0_66] : memref<10x10x32xbf16, #tpu.memory_space<vmem>>, vector<8x8x32xbf16>
    %c2_67 = arith.constant 2 : index
    %c2_68 = arith.constant 2 : index
    %c0_69 = arith.constant 0 : index
    %52 = vector.load %arg7[%c2_67, %c2_68, %c0_69] : memref<10x10x32xbf16, #tpu.memory_space<vmem>>, vector<8x8x32xbf16>
    %53 = tpu.concatenate %47, %48, %49, %50, %51, %52 in 2 : vector<8x8x32xbf16>, vector<8x8x32xbf16>, vector<8x8x32xbf16>, vector<8x8x32xbf16>, vector<8x8x32xbf16>, vector<8x8x32xbf16> -> vector<8x8x192xbf16>
    %c1_70 = arith.constant 1 : index
    %c0_71 = arith.constant 0 : index
    %c0_72 = arith.constant 0 : index
    %54 = vector.load %arg2[%c1_70, %c0_71, %c0_72] : memref<2x192x32xbf16, #tpu.memory_space<vmem>>, vector<1x192x32xbf16>
    %55 = vector.shape_cast %54 : vector<1x192x32xbf16> to vector<192x32xbf16>
    %cst_73 = arith.constant dense<0.000000e+00> : vector<8x8x32xf32>
    %56 = tpu.matmul %53, %55, %cst_73 {dimension_numbers = #tpu.dot_dimension_numbers<[2], [0], [0, 1], [1], [0, 0, 0, 1, 1, 1], [], []>} : vector<8x8x192xbf16>, vector<192x32xbf16>, vector<8x8x32xf32> -> vector<8x8x32xf32>
    %57 = vector.broadcast %18 : vector<1x1x32xf32> to vector<8x8x32xf32>
    %58 = arith.addf %56, %57 : vector<8x8x32xf32>
    %c0_74 = arith.constant 0 : index
    %c0_75 = arith.constant 0 : index
    %c1_76 = arith.constant 1 : index
    %c0_77 = arith.constant 0 : index
    %c0_78 = arith.constant 0 : index
    %59 = vector.load %arg4[%c0_74, %c0_75, %c1_76, %c0_77, %c0_78] : memref<1x8x2x8x32xf32, #tpu.memory_space<vmem>>, vector<1x8x1x8x32xf32>
    %60 = vector.shape_cast %59 : vector<1x8x1x8x32xf32> to vector<8x8x32xf32>
    %61 = vector.shape_cast %58 : vector<8x8x32xf32> to vector<1x8x1x8x32xf32>
    tpu.vector_store %arg4[%c0_74, %c0_75, %c1_76, %c0_77, %c0_78], %61 {strides = array<i32>} : memref<1x8x2x8x32xf32, #tpu.memory_space<vmem>>, vector<1x8x1x8x32xf32>,
    %cst_79 = arith.constant dense<0.000000e+00> : vector<8x32xf32>
    %62 = vector.multi_reduction <add>, %58, %cst_79 [0] : vector<8x8x32xf32> to vector<8x32xf32>
    %cst_80 = arith.constant dense<0.000000e+00> : vector<32xf32>
    %63 = vector.multi_reduction <add>, %62, %cst_80 [0] : vector<8x32xf32> to vector<32xf32>
    %64 = vector.shape_cast %63 : vector<32xf32> to vector<1x32xf32>
    %65 = arith.mulf %58, %58 : vector<8x8x32xf32>
    %cst_81 = arith.constant dense<0.000000e+00> : vector<8x32xf32>
    %66 = vector.multi_reduction <add>, %65, %cst_81 [0] : vector<8x8x32xf32> to vector<8x32xf32>
    %cst_82 = arith.constant dense<0.000000e+00> : vector<32xf32>
    %67 = vector.multi_reduction <add>, %66, %cst_82 [0] : vector<8x32xf32> to vector<32xf32>
    %68 = vector.shape_cast %67 : vector<32xf32> to vector<1x32xf32>
    %69 = vector.shape_cast %64 : vector<1x32xf32> to vector<1x1x32xf32>
    %70 = vector.shape_cast %68 : vector<1x32xf32> to vector<1x1x32xf32>
    %71 = arith.addf %45, %69 : vector<1x1x32xf32>
    %72 = arith.addf %46, %70 : vector<1x1x32xf32>
    %c0_83 = arith.constant 0 : index
    %c0_84 = arith.constant 0 : index
    %c0_85 = arith.constant 0 : index
    %73 = vector.load %arg5[%c0_83, %c0_84, %c0_85] : memref<1x1x32xf32, #tpu.memory_space<vmem>>, vector<1x1x32xf32>
    tpu.vector_store %arg5[%c0_83, %c0_84, %c0_85], %71 {strides = array<i32>} : memref<1x1x32xf32, #tpu.memory_space<vmem>>, vector<1x1x32xf32>,
    %c0_86 = arith.constant 0 : index
    %c0_87 = arith.constant 0 : index
    %c0_88 = arith.constant 0 : index
    %74 = vector.load %arg6[%c0_86, %c0_87, %c0_88] : memref<1x1x32xf32, #tpu.memory_space<vmem>>, vector<1x1x32xf32>
    tpu.vector_store %arg6[%c0_86, %c0_87, %c0_88], %72 {strides = array<i32>} : memref<1x1x32xf32, #tpu.memory_space<vmem>>, vector<1x1x32xf32>,
    return
  }
  func.func @transform_0(%arg0: i32) -> (i32, i32, i32, i32) {
    %c0_i32 = arith.constant 0 : i32
    %c0_i32_0 = arith.constant 0 : i32
    %c0_i32_1 = arith.constant 0 : i32
    %c0_i32_2 = arith.constant 0 : i32
    return %arg0, %c0_i32, %c0_i32_0, %c0_i32_1 : i32, i32, i32, i32
  }
  func.func @transform_1(%arg0: i32) -> (i32, i32, i32) {
    %c0_i32 = arith.constant 0 : i32
    %c0_i32_0 = arith.constant 0 : i32
    %c0_i32_1 = arith.constant 0 : i32
    %c0_i32_2 = arith.constant 0 : i32
    return %c0_i32, %c0_i32_0, %c0_i32_1 : i32, i32, i32
  }
  func.func @transform_2(%arg0: i32) -> (i32, i32, i32) {
    %c0_i32 = arith.constant 0 : i32
    %c0_i32_0 = arith.constant 0 : i32
    %c0_i32_1 = arith.constant 0 : i32
    %c0_i32_2 = arith.constant 0 : i32
    return %c0_i32, %c0_i32_0, %c0_i32_1 : i32, i32, i32
  }
  func.func @transform_3(%arg0: i32) -> (i32, i32, i32, i32, i32) {
    %c0_i32 = arith.constant 0 : i32
    %c0_i32_0 = arith.constant 0 : i32
    %c0_i32_1 = arith.constant 0 : i32
    %c0_i32_2 = arith.constant 0 : i32
    %c0_i32_3 = arith.constant 0 : i32
    return %arg0, %c0_i32, %c0_i32_0, %c0_i32_1, %c0_i32_2 : i32, i32, i32, i32, i32
  }
  func.func @transform_4(%arg0: i32) -> (i32, i32, i32) {
    %c0_i32 = arith.constant 0 : i32
    %c0_i32_0 = arith.constant 0 : i32
    %c0_i32_1 = arith.constant 0 : i32
    return %arg0, %c0_i32, %c0_i32_0 : i32, i32, i32
  }
  func.func @transform_5(%arg0: i32) -> (i32, i32, i32) {
    %c0_i32 = arith.constant 0 : i32
    %c0_i32_0 = arith.constant 0 : i32
    %c0_i32_1 = arith.constant 0 : i32
    return %arg0, %c0_i32, %c0_i32_0 : i32, i32, i32
  }
}

</mosaic_0001>

<bundles_post_ra>
// kernel: tpu_custom_call.1
= control target key start
LH: loop header
LB: loop body
LE: loop exit
PB: predicated region body
PF: predicated region fallthrough
CT: control target
= control target key end

     0   :  { %11 = vsyncpa [#allocation4], 0  ;;  %s3549_s0 = inlined_call_operand.vmem [shape: f32[2,8,8,32], index: 0, kind: input, shape index: {}]   ;;  %s3550_s1 = inlined_call_operand.vmem [shape: bf16[2,192,32], index: 1, kind: input, shape index: {}]   ;;  %s3551_s2 = inlined_call_operand.vmem [shape: f32[1,1,32], index: 2, kind: input, shape index: {}]   ;;  %s3552_s3 = inlined_call_operand.hbm [shape: f32[2,8,2,8,32], index: 3, kind: output, shape index: {0}]   ;;  %s3553_s4 = inlined_call_operand.hbm [shape: f32[2,1,32], index: 4, kind: output, shape index: {1}]   ;;  %s3554_s5 = inlined_call_operand.hbm [shape: f32[2,1,32], index: 5, kind: output, shape index: {2}]  }
   0x1   :  { %13 = vsyncpa [#allocation4 + $0x1], 0 }
   0x2   :  { %14 = vsyncpa [#allocation6], 0 }
   0x3   :  { %16 = vsyncpa [#allocation6 + $0x1], 0  ;;  %s2635_s18 = smov 0   ;;  %s2637_s19 = smov 0  }
   0x4   :  { %s2639_s20 = smov 0   ;;  %s2641_s21 = smov 0  }
   0x5 LB: > { %s2656_s22 = sadd.s32 4294967295, %s2594_s21   ;;  %s2131_s23 = sadd.s32 4294967294, %s2594_s21   ;;  %s2594_s21 = sphi %s2641_s21, %s3569_s21   ;;  %s2590_s20 = sphi %s2639_s20, %s3568_s20   ;;  %s2586_s19 = sphi %s2637_s19, %s3567_s19   ;;  %s2582_s18 = sphi %s2635_s18, %s3566_s18  }
   0x6   : > { %s2660_s24 = sadd.s32 1, %s2594_s21   ;;  %s97_s25 = sadd.s32 1, %s2590_s20 }
   0x7   : > { %s94_s26 = ssub.s32 %s2594_s21, %s2660_s24  ;;  %p107_p0 = scmp.ne.s32.totalorder %s2590_s20, %s2586_s19 }
   0x8   : > { %p95_p1 = scmp.eq.s32.totalorder %s94_s26, 0  ;;  %p108_p2 = scmp.eq.s32.totalorder %s2656_s22, 1 }
   0x9   : > { %p113_p3 = scmp.ne.s32.totalorder %s2586_s19, %s2582_s18  ;;  %p114_p4 = scmp.eq.s32.totalorder %s2131_s23, 1 }
   0xa   : > { %s2673_s27 = scalar_select %p95_p1, %s2590_s20, %s97_s25  }
   0xb   : > { %p2675_p5 = por %p108_p2, %p107_p0  ;;  %p2679_p6 = por %p114_p4, %p113_p3 }
   0xc   : > { %p2134_p7 = scmp.ge.s32.totalorder %s2594_s21, 1  ;;  %p198_p8 = scmp.lt.s32.totalorder %s2594_s21, 3 }
   0xe   : > { %p199_p9 = pnand %p2134_p7, %p198_p8 }
  0x10   : > { %202 = sbr.rel (%p199_p9) target bundleno = 561 (0x231), region = 32 }
  0x15   : > { %vm361_vm0 = vcmask 257024   ;;  %vm367_vm1 = vcmask 253952   ;;  %v2596_v0 = vmov 0   ;;  %p234_p10 = scmp.lt.s32.totalorder %s2656_s22, 1  ;;  %vm368_vm2 = vsmask.f32 256 }
  0x16   : > { %416 = vst.msk [vmem:[#allocation2] sm:$0xf] %vm361_vm0, %v2596_v0  ;;  %420 = vst.msk [vmem:[#allocation2 + $0x48] sm:$0xf] %vm361_vm0, %v2596_v0  ;;  %1101 = vmatprep.subr.bf16.mxu0 %v2596_v0  ;;  %1838 = vmatprep.subr.bf16.mxu1 %v2596_v0  ;;  %vm362_vm3 = vsmask.f32 7938 }
  0x17   : > { %418 = vst.msk [vmem:[#allocation2 + $0x4] sm:$0x1] %vm367_vm1, %v2596_v0  ;;  %421 = vst.msk [vmem:[#allocation2 + $0x4c] sm:$0x1] %vm367_vm1, %v2596_v0  ;;  %s235_s30 = scalar_select %p234_p10, %s2656_s22, 1  ;;  %v2438_v1 = vld [vmem:[%s3550_s1 + $0x38] sm:$0xff]  }
  0x18   : > { %vm2701_vm4 = vmand %vm367_vm1, %vm368_vm2  ;;  %1102 = vmatpush1.bf16.msra.mxu0 %v2438_v1  ;;  %v373_v22 = vld [vmem:[#allocation2 + $0x10] sm:$0xf]  ;;  %v376_v23 = vld [vmem:[#allocation2 + $0x14] sm:$0x1]  ;;  %s2597_s9 = smov 64   ;;  %s2598_s15 = smov 32  }
  0x19   : > { %s2314_s8 = sshll.u32 %s235_s30, 6  ;;  %vm2707_vm5 = vmand %vm367_vm1, %vm362_vm3  ;;  %1103 = vmatprep.subr.bf16.mxu0 %v2596_v0  ;;  %v364_v24 = vld [vmem:[#allocation2 + $0x8] sm:$0xf]  ;;  %v370_v27 = vld [vmem:[#allocation2 + $0xc] sm:$0x1]  ;;  %s2599_s25 = smov 96  }
  0x1a   : > { %s2714_s11 = scalar_lea.vmem %s3549_s0, %s2314_s8  ;;  %v379_v32 = vld [vmem:[#allocation2 + $0x18] sm:$0xf]  ;;  %v382_v33 = vld [vmem:[#allocation2 + $0x1c] sm:$0x1]  ;;  %vm2736_vm6 = vmand %vm361_vm0, %vm362_vm3  ;;  %vm860_vm7 = vcmask 261120   ;;  %vm885_vm8 = vcmask 523264  }
  0x1b   : > { %v241_v4 = vld [vmem:[%s2714_s11 + $0x8] sm:$0xff]  ;;  %v240_v5 = vld [vmem:[%s2714_s11] sm:$0xff]  ;;  %v242_v6 = vld [vmem:[%s2714_s11 + $0x10] sm:$0xff]  ;;  %vm902_vm9 = vcmask 785408   ;;  %s2323_s10 = sshll.u32 %s2656_s22, 11  ;;  %s2600_s30 = smov [#allocation3]  }
  0x1c   : > { %v2316_v9 = vpack.c.bf16 %v241_v4, %v241_v4  ;;  %v2315_v10 = vpack.c.bf16 %v240_v5, %v240_v5  ;;  %v2317_v11 = vpack.c.bf16 %v242_v6, %v242_v6  ;;  %v243_v14 = vld [vmem:[%s2714_s11 + $0x18] sm:$0xff]  ;;  %v244_v15 = vld [vmem:[%s2714_s11 + $0x20] sm:$0xff]  ;;  %v245_v16 = vld [vmem:[%s2714_s11 + $0x28] sm:$0xff]  ;;  %s3424_s16 = scalar_lea.hbm %s3552_s3, %s2323_s10  ;;  %s2482_s6 = sshll.u32 %s2600_s30, 4  ;;  %s2483_s6 = int_to_ptr.vmem [resolvable:$false] %s2482_s6 }
  0x1d   : > { %v422_v8 = vld [vmem:[#allocation2] sm:$0x1]  ;;  %v246_v21 = vld [vmem:[%s2714_s11 + $0x30] sm:$0xff]  ;;  %v2318_v28 = vpack.c.bf16 %v243_v14, %v243_v14  ;;  %v2728_v29 = vpack.c.bf16 %v244_v15, %v244_v15  ;;  %v2730_v34 = vpack.c.bf16 %v245_v16, %v245_v16  ;;  %v500_v36 = vld [vmem:[#allocation2] sm:$0xe]  ;;  %s2484_s7 = scalar_lea.vmem %s2483_s6, 4096 }
  0x1e   : > { %v453_v7 = vld [vmem:[#allocation2 + $0x4] sm:$0x1]  ;;  %v423_v13 = vsel %vm2701_vm4, 0, %v422_v8  ;;  %v289_v17 = vshrl.u32 %v2316_v9, 16  ;;  %v292_v18 = vshll.u32 %v2316_v9, 16  ;;  %v281_v19 = vshrl.u32 %v2315_v10, 16 }
  0x1f   : > { %v454_v12 = vsel %vm2707_vm5, 0, %v453_v7  ;;  %424 = vst [vmem:[#allocation2] sm:$0x1] %v423_v13  ;;  %v284_v20 = vshll.u32 %v2315_v10, 16  ;;  %v297_v25 = vshrl.u32 %v2317_v11, 16  ;;  %v300_v26 = vshll.u32 %v2317_v11, 16 }
  0x20   : > { %455 = vst [vmem:[#allocation2 + $0x4] sm:$0x1] %v454_v12  ;;  %v291_v30 = vrot.slane %v289_v17, 7  ;;  %v283_v31 = vrot.slane %v281_v19, 7  ;;  %v2732_v35 = vpack.c.bf16 %v246_v21, %v246_v21  ;;  %v305_v39 = vshrl.u32 %v2318_v28, 16  ;;  %v2441_v48 = vld [vmem:[%s3550_s1 + $0x30] sm:$0xff]  }
  0x21   : > { %v299_v38 = vrot.slane %v297_v25, 7  ;;  %v308_v40 = vshll.u32 %v2318_v28, 16  ;;  %v313_v41 = vshrl.u32 %v2728_v29, 16  ;;  %v385_v46 = vld [vmem:[#allocation2 + $0x20] sm:$0xf]  ;;  %v2444_v49 = vld [vmem:[%s3550_s1 + $0x28] sm:$0xff]   ;;  %1104 = vmatpush1.bf16.msra.mxu0 %v2441_v48 }
  0x22   : > { %v294_v42 = vor.u32 %v292_v18, %v291_v30  ;;  %v295_v43 = vrot.slane %v291_v30, 4  ;;  %v286_v44 = vor.u32 %v284_v20, %v283_v31  ;;  %v287_v45 = vrot.slane %v283_v31, 4  ;;  %v388_v47 = vld [vmem:[#allocation2 + $0x24] sm:$0x1]  ;;  %v2445_v54 = vld [vmem:[%s3550_s1 + $0x98] sm:$0xff]   ;;  %1105 = vmatprep.subr.bf16.mxu0 %v2596_v0  ;;  %v2449_v14 = vld [vmem:[%s3550_s1 + $0x90] sm:$0xff]  }
  0x23   : > { %v302_v50 = vor.u32 %v300_v26, %v299_v38  ;;  %v303_v51 = vrot.slane %v299_v38, 4  ;;  %v307_v52 = vrot.slane %v305_v39, 7  ;;  %v315_v53 = vrot.slane %v313_v41, 7  ;;  %v394_v59 = vld [vmem:[#allocation2 + $0x2c] sm:$0x1]  ;;  %1839 = vmatpush1.bf16.msra.mxu1 %v2445_v54  ;;  %v2448_v20 = vld [vmem:[%s3550_s1 + $0x20] sm:$0xff]  }
  0x24   : > { %v374_v55 = vsel %vm2736_vm6, %v294_v42, %v373_v22  ;;  %v377_v56 = vsel %vm2701_vm4, %v295_v43, %v376_v23  ;;  %v365_v57 = vsel %vm2736_vm6, %v286_v44, %v364_v24  ;;  %v371_v58 = vsel %vm2701_vm4, %v287_v45, %v370_v27  ;;  %v391_v5 = vld [vmem:[#allocation2 + $0x28] sm:$0xf]  ;;  %1840 = vmatprep.subr.bf16.mxu1 %v2596_v0  ;;  %v397_v19 = vld [vmem:[#allocation2 + $0x30] sm:$0xf]  ;;  %v400_v23 = vld [vmem:[#allocation2 + $0x34] sm:$0x1] }
  0x25   : > { %375 = vst [vmem:[#allocation2 + $0x10] sm:$0xf] %v374_v55  ;;  %378 = vst [vmem:[#allocation2 + $0x14] sm:$0x1] %v377_v56  ;;  %v380_v62 = vsel %vm2736_vm6, %v302_v50, %v379_v32  ;;  %v383_v63 = vsel %vm2701_vm4, %v303_v51, %v382_v33  ;;  %v310_v1 = vor.u32 %v308_v40, %v307_v52  ;;  %v311_v4 = vrot.slane %v307_v52, 4  ;;  %v2454_v25 = vld [vmem:[%s3550_s1 + $0x88] sm:$0xff]  }
  0x26   : > { %v484_v61 = vld [vmem:[#allocation2] sm:$0xf]  ;;  %366 = vst [vmem:[#allocation2 + $0x8] sm:$0xf] %v365_v57  ;;  %372 = vst [vmem:[#allocation2 + $0xc] sm:$0x1] %v371_v58  ;;  %1106 = vmatpush1.bf16.msra.mxu0 %v2444_v49 }
  0x27   : > { %v492_v60 = vld [vmem:[#allocation2 + $0x4] sm:$0x1]  ;;  %381 = vst [vmem:[#allocation2 + $0x18] sm:$0xf] %v380_v62  ;;  %384 = vst [vmem:[#allocation2 + $0x1c] sm:$0x1] %v383_v63  ;;  %v386_v10 = vsel %vm2736_vm6, %v310_v1, %v385_v46  ;;  %v389_v11 = vsel %vm2701_vm4, %v311_v4, %v388_v47  ;;  %1107 = vmatprep.subr.bf16.mxu0 %v2596_v0  ;;  %1841 = vmatpush1.bf16.msra.mxu1 %v2449_v14 }
  0x28   : > { %v2154_v6 = vcombine.low %v500_v36, %v492_v60  ;;  %v2146_v7 = vcombine.low %v484_v61, %v492_v60  ;;  %v316_v8 = vshll.u32 %v2728_v29, 16  ;;  %v319_v9 = vrot.slane %v315_v53, 4  ;;  %387 = vst [vmem:[#allocation2 + $0x20] sm:$0xf] %v386_v10  ;;  %390 = vst [vmem:[#allocation2 + $0x24] sm:$0x1] %v389_v11  ;;  %1842 = vmatprep.subr.bf16.mxu1 %v2596_v0 }
  0x29   : > { %v321_v12 = vshrl.u32 %v2730_v34, 16  ;;  %v324_v13 = vshll.u32 %v2730_v34, 16  ;;  %v329_v24 = vshrl.u32 %v2732_v35, 16  ;;  %v332_v28 = vshll.u32 %v2732_v35, 16  ;;  %v403_v32 = vld [vmem:[#allocation2 + $0x38] sm:$0xf] }
  0x2a   : > { %v668_v15 = vrot.slane %v2154_v6, 1  ;;  %v575_v16 = vshll.u32 %v2146_v7, 16  ;;  %v573_v17 = vshrl.u32 %v2146_v7, 16  ;;  %v318_v18 = vor.u32 %v316_v8, %v315_v53  ;;  %v406_v33 = vld [vmem:[#allocation2 + $0x3c] sm:$0x1]  ;;  %1108 = vmatpush1.bf16.msra.mxu0 %v2448_v20  ;;  %v2459_v45 = vld [vmem:[%s3550_s1 + $0x80] sm:$0xff]  }
  0x2b   : > { %v395_v21 = vsel %vm2701_vm4, %v319_v9, %v394_v59  ;;  %v323_v22 = vrot.slane %v321_v12, 7  ;;  %v331_v31 = vrot.slane %v329_v24, 7  ;;  %v2453_v34 = vld [vmem:[%s3550_s1 + $0x18] sm:$0xff]   ;;  %1109 = vmatprep.subr.bf16.mxu0 %v2596_v0  ;;  %1843 = vmatpush1.bf16.msra.mxu1 %v2454_v25  ;;  %v2458_v54 = vld [vmem:[%s3550_s1 + $0x10] sm:$0xff]   ;;  %v2462_v20 = vld [vmem:[%s3550_s1 + $0x8] sm:$0xff]  }
  0x2c   : > { %676 = vrot.lane.b32.xlu0 %v668_v15, %s2597_s9  ;;  %v577_v26 = vrot.slane %v575_v16, 1  ;;  %v392_v27 = vsel %vm2736_vm6, %v318_v18, %v391_v5  ;;  %396 = vst [vmem:[#allocation2 + $0x2c] sm:$0x1] %v395_v21  ;;  %v428_v38 = vld [vmem:[#allocation2 + $0x10] sm:$0x1]  ;;  %1844 = vmatprep.subr.bf16.mxu1 %v2596_v0  ;;  %v247_v25 = vld [vmem:[%s2714_s11 + $0x38] sm:$0xff] }
  0x2d   : > { %393 = vst [vmem:[#allocation2 + $0x28] sm:$0xf] %v392_v27  ;;  %v326_v29 = vor.u32 %v324_v13, %v323_v22  ;;  %v327_v30 = vrot.slane %v323_v22, 4  ;;  %v459_v39 = vld [vmem:[#allocation2 + $0x14] sm:$0x1]  ;;  %v429_v35 = vsel %vm2701_vm4, 0, %v428_v38  ;;  %v334_v49 = vor.u32 %v332_v28, %v331_v31 }
  0x2e   : > { %v578_v36 = vor.u32 %v577_v26, %v573_v17  ;;  %v425_v40 = vld [vmem:[#allocation2 + $0x8] sm:$0x1]  ;;  %v460_v41 = vsel %vm2707_vm5, 0, %v459_v39  ;;  %v431_v43 = vld [vmem:[#allocation2 + $0x18] sm:$0x1]  ;;  %v335_v50 = vrot.slane %v331_v31, 4  ;;  %1110 = vmatpush1.bf16.msra.mxu0 %v2453_v34  ;;  %v2850_v38 = vpack.c.bf16 %v247_v25, %v247_v25 }
  0x2f   : > { %v426_v42 = vsel %vm2701_vm4, 0, %v425_v40  ;;  %v398_v44 = vsel %vm2736_vm6, %v326_v29, %v397_v19  ;;  %430 = vst [vmem:[#allocation2 + $0x10] sm:$0x1] %v429_v35  ;;  %461 = vst [vmem:[#allocation2 + $0x14] sm:$0x1] %v460_v41  ;;  %v432_v46 = vsel %vm2701_vm4, 0, %v431_v43  ;;  %v401_v48 = vsel %vm2701_vm4, %v327_v30, %v400_v23  ;;  %1111 = vmatprep.subr.bf16.mxu0 %v2596_v0 }
  0x30   : > { %628 = vrot.lane.b32.xlu0 %v578_v36, %s2598_s15  ;;  %427 = vst [vmem:[#allocation2 + $0x8] sm:$0x1] %v426_v42  ;;  %v456_v47 = vld [vmem:[#allocation2 + $0xc] sm:$0x1]  ;;  %399 = vst [vmem:[#allocation2 + $0x30] sm:$0xf] %v398_v44  ;;  %v404_v52 = vsel %vm2736_vm6, %v334_v49, %v403_v32  ;;  %v407_v53 = vsel %vm2701_vm4, %v335_v50, %v406_v33  ;;  %1845 = vmatpush1.bf16.msra.mxu1 %v2459_v45 }
  0x31   : > { %433 = vst [vmem:[#allocation2 + $0x18] sm:$0x1] %v432_v46  ;;  %v457_v51 = vsel %vm2707_vm5, 0, %v456_v47  ;;  %402 = vst [vmem:[#allocation2 + $0x34] sm:$0x1] %v401_v48  ;;  %1846 = vmatprep.subr.bf16.mxu1 %v2596_v0  ;;  %v2463_v31 = vld [vmem:[%s3550_s1 + $0x78] sm:$0xff]  }
  0x32   : > { %458 = vst [vmem:[#allocation2 + $0xc] sm:$0x1] %v457_v51  ;;  %v462_v55 = vld [vmem:[#allocation2 + $0x1c] sm:$0x1]  ;;  %405 = vst [vmem:[#allocation2 + $0x38] sm:$0xf] %v404_v52  ;;  %1112 = vmatpush1.bf16.msra.mxu0 %v2458_v54 }
  0x33   : > { %408 = vst [vmem:[#allocation2 + $0x3c] sm:$0x1] %v407_v53  ;;  %v463_v56 = vsel %vm2707_vm5, 0, %v462_v55  ;;  %v434_v57 = vld [vmem:[#allocation2 + $0x20] sm:$0x1]  ;;  %1113 = vmatprep.subr.bf16.mxu0 %v2596_v0  ;;  %v2466_v42 = vld [vmem:[%s3550_s1 + $0x70] sm:$0xff]  }
  0x34   : > { %464 = vst [vmem:[#allocation2 + $0x1c] sm:$0x1] %v463_v56  ;;  %v465_v58 = vld [vmem:[#allocation2 + $0x24] sm:$0x1]  ;;  %v501_v59 = vld [vmem:[#allocation2 + $0x8] sm:$0xe]  ;;  %1847 = vmatpush1.bf16.msra.mxu1 %v2463_v31 }
  0x35   : > { %v435_v60 = vsel %vm2701_vm4, 0, %v434_v57  ;;  %v466_v61 = vsel %vm2707_vm5, 0, %v465_v58  ;;  %v524_v9 = vld [vmem:[#allocation2 + $0x8] sm:$0xe]  ;;  %v525_v15 = vld [vmem:[#allocation2 + $0x10] sm:$0xe]  ;;  %1848 = vmatprep.subr.bf16.mxu1 %v2596_v0 }
  0x36   : > { %v509_v62 = vld [vmem:[#allocation2 + $0x10] sm:$0xf]  ;;  %v517_v63 = vld [vmem:[#allocation2 + $0x14] sm:$0x1]  ;;  %436 = vst [vmem:[#allocation2 + $0x20] sm:$0x1] %v435_v60  ;;  %1114 = vmatpush1.bf16.msra.mxu0 %v2462_v20 }
  0x37   : > { %v508_v1 = vld [vmem:[#allocation2 + $0x8] sm:$0xf]  ;;  %467 = vst [vmem:[#allocation2 + $0x24] sm:$0x1] %v466_v61  ;;  %v2163_v4 = vcombine.low %v509_v62, %v509_v62  ;;  %v2828_v5 = vcombine.low %v509_v62, %v517_v63  ;;  %v1253_v8 = vld [vmem:[#allocation2 + $0x10] sm:$0xf]  ;;  %v2179_v22 = vcombine.low %v525_v15, %v517_v63  ;;  %1115 = vmatprep.subr.bf16.mxu0 %v2596_v0 }
  0x38   : > { %v2162_v6 = vcombine.low %v508_v1, %v508_v1  ;;  %v1254_v7 = vld [vmem:[#allocation2 + $0x18] sm:$0xf]  ;;  %v2227_v13 = vcombine.low %v1253_v8, %v1253_v8  ;;  %v1244_v19 = vld [vmem:[#allocation2 + $0x8] sm:$0xe]  ;;  %v1261_v21 = vld [vmem:[#allocation2 + $0x14] sm:$0x1]  ;;  %1849 = vmatpush1.bf16.msra.mxu1 %v2466_v42 }
  0x39   : > { %v493_v10 = vld [vmem:[#allocation2 + $0xc] sm:$0x1]  ;;  %718 = vrot.lane.b32.xlu1 %v2163_v4, %s2599_s25  ;;  %v2228_v12 = vcombine.low %v1254_v7, %v1254_v7  ;;  %v2837_v23 = vcombine.low %v1253_v8, %v1261_v21  ;;  %v2842_v27 = vld [vmem:[#allocation2 + $0x8] sm:$0xf]  ;;  %v1237_v32 = vld [vmem:[#allocation2 + $0x14] sm:$0x1]  ;;  %1850 = vmatprep.subr.bf16.mxu1 %v2596_v0 }
  0x3a   : > { %v516_v11 = vld [vmem:[#allocation2 + $0xc] sm:$0x1]  ;;  %716 = vrot.lane.b32.xlu0 %v2162_v6, %s2599_s25  ;;  %v2155_v14 = vcombine.low %v501_v59, %v493_v10  ;;  %v1245_v33 = vld [vmem:[#allocation2 + $0x10] sm:$0xe]  ;;  %v1270_v36 = vld [vmem:[#allocation2 + $0x18] sm:$0xe]  ;;  %v2856_v40 = vcombine.low %v2842_v27, %v493_v10 }
  0x3b   : > { %v2832_v16 = vcombine.low %v508_v1, %v516_v11  ;;  %v2178_v17 = vcombine.low %v524_v9, %v516_v11  ;;  %v1236_v18 = vld [vmem:[#allocation2 + $0xc] sm:$0x1]  ;;  %v1262_v24 = vld [vmem:[#allocation2 + $0x1c] sm:$0x1]  ;;  %v1269_v34 = vld [vmem:[#allocation2 + $0x10] sm:$0xe]  ;;  %v2220_v47 = vcombine.low %v1245_v33, %v1237_v32 }
  0x3c   : > { %v669_v26 = vrot.slane %v2155_v14, 1  ;;  %v2219_v29 = vcombine.low %v1244_v19, %v1236_v18  ;;  %v2844_v30 = vcombine.low %v1254_v7, %v1262_v24  ;;  %v2465_v39 = vld [vmem:[%s3550_s1] sm:$0xff]   ;;  %v494_v35 = vld [vmem:[#allocation2 + $0x14] sm:$0x1]  ;;  %v502_v41 = vld [vmem:[#allocation2 + $0x10] sm:$0xe]  ;;  %v2243_v48 = vcombine.low %v1269_v34, %v1261_v21 }
  0x3d   : > { %1463 = vrot.lane.b32.xlu1 %v2228_v12, %s2599_s25  ;;  %v836_v28 = vrot.slane %v2178_v17, 1  ;;  %v837_v43 = vrot.slane %v2179_v22, 1  ;;  %v2864_v44 = vld [vmem:[#allocation2 + $0x8] sm:$0xf]  ;;  %v2866_v46 = vld [vmem:[#allocation2 + $0x10] sm:$0xf]  ;;  %1116 = vmatpush1.bf16.msra.mxu0 %v2465_v39  ;;  %v2244_v50 = vcombine.low %v1270_v36, %v1262_v24  ;;  %v2156_v51 = vcombine.low %v502_v41, %v494_v35 }
  0x3e   : > { %1461 = vrot.lane.b32.xlu0 %v2227_v13, %s2599_s25  ;;  %v1413_v45 = vrot.slane %v2219_v29, 1  ;;  %v2868_v49 = vld [vmem:[#allocation2 + $0x10] sm:$0xf]  ;;  %v337_v52 = vshrl.u32 %v2850_v38, 16  ;;  %1125 = vmatprep.subr.bf16.mxu0 %v2596_v0  ;;  %v2467_v53 = vld [vmem:[%s3550_s1 + $0x58] sm:$0xff]   ;;  %v2876_v54 = vcombine.low %v2864_v44, %v1236_v18  ;;  %v2879_v55 = vcombine.low %v2866_v46, %v1237_v32  ;;  %v2468_v9 = vld [vmem:[%s3550_s1 + $0x68] sm:$0xff]  }
  0x3f   : > { %v503_v56 = vld [vmem:[#allocation2 + $0x18] sm:$0xe]  ;;  %v1414_v57 = vrot.slane %v2220_v47, 1  ;;  %v1581_v58 = vrot.slane %v2243_v48, 1  ;;  %v2885_v59 = vcombine.low %v2868_v49, %v494_v35  ;;  %v495_v60 = vld [vmem:[#allocation2 + $0x1c] sm:$0x1]  ;;  %1851 = vmatpush1.bf16.msra.mxu1 %v2468_v9 }
  0x40   : > { %v582_v61 = vshll.u32 %v2856_v40, 16  ;;  %v2888_v62 = vld [vmem:[#allocation2 + $0x18] sm:$0xf]  ;;  %v2892_v1 = vld [vmem:[#allocation2 + $0x1c] sm:$0x1]  ;;  %v1582_v4 = vrot.slane %v2244_v50, 1  ;;  %v2157_v10 = vcombine.low %v503_v56, %v495_v60  ;;  %1852 = vmatprep.subr.bf16.mxu1 %v2596_v0 }
  0x41   : > { %678 = vrot.lane.b32.xlu1 %v669_v26, %s2597_s9  ;;  %v2890_v63 = vld [vmem:[#allocation2 + $0x18] sm:$0xf]  ;;  %1126 = vmatpush2.bf16.msra.mxu0 %v2467_v53  ;;  %v670_v6 = vrot.slane %v2156_v51, 1  ;;  %v2894_v7 = vld [vmem:[#allocation2 + $0x1c] sm:$0x1]  ;;  %v2896_v8 = vrot.slane %v337_v52, 7  ;;  %v2929_v29 = vcombine.low %v2888_v62, %v495_v60 }
  0x42   : > { %844 = vrot.lane.b32.xlu0 %v836_v28, %s2598_s15  ;;  %1127 = vmatprep.subr.bf16.mxu0 %v2596_v0  ;;  %v580_v11 = vshrl.u32 %v2856_v40, 16  ;;  %v1318_v12 = vshrl.u32 %v2876_v54, 16  ;;  %v1320_v13 = vshll.u32 %v2876_v54, 16  ;;  %v468_v14 = vld [vmem:[#allocation2 + $0x2c] sm:$0x1]  ;;  %v584_v15 = vrot.slane %v582_v61, 1 }
  0x43   : > { %v589_v17 = vshll.u32 %v2885_v59, 16  ;;  %v1327_v18 = vshll.u32 %v2879_v55, 16  ;;  %v2911_v19 = vcombine.low %v2890_v63, %v2892_v1  ;;  %v2913_v20 = vld [vmem:[#allocation2 + $0x24] sm:$0x1]  ;;  %v2915_v21 = vld [vmem:[#allocation2 + $0x18] sm:$0xf] }
  0x44   : > { %v2469_v22 = vld [vmem:[%s3550_s1 + $0x50] sm:$0xff]   ;;  %v2920_v24 = vld [vmem:[#allocation2 + $0x24] sm:$0x1]  ;;  %v2924_v25 = vcombine.low %v2915_v21, %v2894_v7  ;;  %v2926_v26 = vld [vmem:[#allocation2 + $0x20] sm:$0xf]  ;;  %v469_v31 = vsel %vm2707_vm5, 0, %v468_v14 }
  0x45   : > { %846 = vrot.lane.b32.xlu1 %v837_v43, %s2598_s15  ;;  %v437_v28 = vld [vmem:[#allocation2 + $0x28] sm:$0x1]  ;;  %v2935_v32 = vcombine.low %v2926_v26, %v2920_v24  ;;  %v2937_v33 = vld [vmem:[#allocation2 + $0x20] sm:$0xf]  ;;  %v440_v34 = vld [vmem:[#allocation2 + $0x30] sm:$0x1]  ;;  %1128 = vmatpush2.bf16.msra.mxu0 %v2469_v22 }
  0x46   : > { %1421 = vrot.lane.b32.xlu0 %v1413_v45, %s2597_s9  ;;  %v2470_v36 = vld [vmem:[%s3550_s1 + $0x60] sm:$0xff]   ;;  %v671_v39 = vrot.slane %v2157_v10, 1  ;;  %v1322_v40 = vrot.slane %v1320_v13, 1  ;;  %v587_v35 = vshrl.u32 %v2885_v59, 16  ;;  %470 = vst [vmem:[#allocation2 + $0x2c] sm:$0x1] %v469_v31  ;;  %v2948_v42 = vcombine.low %v2937_v33, %v2913_v20  ;;  %1129 = vmatprep.subr.bf16.mxu0 %v2596_v0 }
  0x47   : > { %v2944_v41 = vld [vmem:[#allocation2 + $0x20] sm:$0xf]  ;;  %v471_v43 = vld [vmem:[#allocation2 + $0x34] sm:$0x1]  ;;  %v585_v45 = vor.u32 %v584_v15, %v580_v11  ;;  %v591_v47 = vrot.slane %v589_v17, 1  ;;  %v1334_v48 = vshll.u32 %v2911_v19, 16  ;;  %1853 = vmatpush1.bf16.msra.mxu1 %v2470_v36 }
  0x48   : > { %v438_v50 = vsel %vm2701_vm4, 0, %v437_v28  ;;  %v474_v51 = vld [vmem:[#allocation2 + $0x3c] sm:$0x1]  ;;  %v412_v52 = vld [vmem:[#allocation2 + $0x44] sm:$0x1]  ;;  %v2471_v54 = vld [vmem:[%s3550_s1 + $0x48] sm:$0xff]   ;;  %1862 = vmatprep.subr.bf16.mxu1 %v2596_v0  ;;  %v1323_v9 = vor.u32 %v1322_v40, %v1318_v12 }
  0x49   : > { %1423 = vrot.lane.b32.xlu1 %v1414_v57, %s2597_s9  ;;  %v480_v53 = vld [vmem:[#allocation2 + $0x4c] sm:$0x1]  ;;  %v1325_v56 = vshrl.u32 %v2879_v55, 16  ;;  %v2960_v57 = vld [vmem:[#allocation2 + $0x24] sm:$0x1]  ;;  %v2472_v59 = vld [vmem:[%s3550_s1 + $0xb8] sm:$0xff]   ;;  %1130 = vmatpush2.bf16.msra.mxu0 %v2471_v54  ;;  %v592_v14 = vor.u32 %v591_v47, %v587_v35 }
  0x4a   : > { %1589 = vrot.lane.b32.xlu0 %v1581_v58, %s2598_s15  ;;  %439 = vst [vmem:[#allocation2 + $0x28] sm:$0x1] %v438_v50  ;;  %v441_v58 = vsel %vm2701_vm4, 0, %v440_v34  ;;  %v1329_v60 = vrot.slane %v1327_v18, 1  ;;  %v596_v61 = vshll.u32 %v2929_v29, 16  ;;  %v475_v55 = vsel %vm2707_vm5, 0, %v474_v51  ;;  %1131 = vmatprep.subr.bf16.mxu0 %v2596_v0 }
  0x4b   : > { %442 = vst [vmem:[#allocation2 + $0x30] sm:$0x1] %v441_v58  ;;  %476 = vst [vmem:[#allocation2 + $0x3c] sm:$0x1] %v475_v55  ;;  %v340_v11 = vshll.u32 %v2850_v38, 16  ;;  %v343_v13 = vrot.slane %v2896_v8, 4  ;;  %v2214_v18 = vcombine.low %v2944_v41, %v2960_v57  ;;  %1863 = vmatpush2.bf16.msra.mxu1 %v2472_v59 }
  0x4c   : > { %v1332_v15 = vshrl.u32 %v2911_v19, 16  ;;  %v1336_v17 = vrot.slane %v1334_v48, 1  ;;  %v526_v12 = vld [vmem:[#allocation2 + $0x18] sm:$0xe]  ;;  %v409_v22 = vld [vmem:[#allocation2 + $0x40] sm:$0xf]  ;;  %1864 = vmatprep.subr.bf16.mxu1 %v2596_v0 }
  0x4d   : > { %1591 = vrot.lane.b32.xlu1 %v1582_v4, %s2598_s15  ;;  %v472_v4 = vsel %vm2707_vm5, 0, %v471_v43  ;;  %v342_v38 = vor.u32 %v340_v11, %v2896_v8  ;;  %v413_v28 = vsel %vm2701_vm4, %v343_v13, %v412_v52  ;;  %v481_v31 = vsel %vm2707_vm5, 0, %v480_v53  ;;  %v2995_v43 = vld [vmem:[#allocation2 + $0x2c] sm:$0x1]  ;;  %v1246_v47 = vld [vmem:[#allocation2 + $0x18] sm:$0xe] }
  0x4e   : > { %680 = vrot.lane.b32.xlu0 %v670_v6, %s2597_s9  ;;  %v443_v6 = vld [vmem:[#allocation2 + $0x38] sm:$0x1]  ;;  %473 = vst [vmem:[#allocation2 + $0x34] sm:$0x1] %v472_v4  ;;  %414 = vst [vmem:[#allocation2 + $0x44] sm:$0x1] %v413_v28  ;;  %v2180_v34 = vcombine.low %v526_v12, %v2894_v7  ;;  %v1330_v8 = vor.u32 %v1329_v60, %v1325_v56  ;;  %v2221_v53 = vcombine.low %v1246_v47, %v2892_v1 }
  0x4f   : > { %v444_v10 = vsel %vm2701_vm4, 0, %v443_v6  ;;  %482 = vst [vmem:[#allocation2 + $0x4c] sm:$0x1] %v481_v31  ;;  %v594_v19 = vshrl.u32 %v2929_v29, 16  ;;  %v410_v36 = vsel %vm2736_vm6, %v342_v38, %v409_v22  ;;  %v598_v40 = vrot.slane %v596_v61, 1  ;;  %v2473_v37 = vld [vmem:[%s3550_s1 + $0x40] sm:$0xff]  }
  0x50   : > { %445 = vst [vmem:[#allocation2 + $0x38] sm:$0x1] %v444_v10  ;;  %v1341_v35 = vshll.u32 %v2214_v18, 16  ;;  %411 = vst [vmem:[#allocation2 + $0x40] sm:$0xf] %v410_v36  ;;  %v2474_v29 = vld [vmem:[%s3550_s1 + $0xb0] sm:$0xff]   ;;  %1132 = vmatpush2.bf16.msra.mxu0 %v2473_v37 }
  0x51   : > { %682 = vrot.lane.b32.xlu1 %v671_v39, %s2597_s9  ;;  %v1337_v39 = vor.u32 %v1336_v17, %v1332_v15  ;;  %v838_v48 = vrot.slane %v2180_v34, 1  ;;  %v599_v50 = vor.u32 %v598_v40, %v594_v19  ;;  %v1339_v51 = vshrl.u32 %v2214_v18, 16  ;;  %v527_v54 = vld [vmem:[#allocation2 + $0x20] sm:$0xe]  ;;  %1865 = vmatpush2.bf16.msra.mxu1 %v2474_v29  ;;  %v2475_v58 = vld [vmem:[%s3550_s1 + $0xa8] sm:$0xff]  }
  0x52   : > { %630 = vrot.lane.b32.xlu0 %v585_v45, %s2598_s15  ;;  %v2997_v45 = vld [vmem:[#allocation2 + $0x28] sm:$0xf]  ;;  %v1343_v52 = vrot.slane %v1341_v35, 1  ;;  %v1271_v56 = vld [vmem:[#allocation2 + $0x20] sm:$0xe]  ;;  %1866 = vmatprep.subr.bf16.mxu1 %v2596_v0  ;;  %v2181_v10 = vcombine.low %v527_v54, %v2913_v20 }
  0x53   : > { %v3001_v7 = vcombine.low %v2997_v45, %v2995_v43  ;;  %v1247_v59 = vld [vmem:[#allocation2 + $0x20] sm:$0xe]  ;;  %v3015_v60 = vld [vmem:[#allocation2 + $0x2c] sm:$0x1]  ;;  %v3017_v61 = vld [vmem:[#allocation2 + $0x28] sm:$0xf]  ;;  %v2245_v11 = vcombine.low %v1271_v56, %v2920_v24 }
  0x54   : > { %v3020_v4 = vld [vmem:[#allocation2 + $0x20] sm:$0xf]  ;;  %v3022_v55 = vld [vmem:[#allocation2 + $0x24] sm:$0x1]  ;;  %v3026_v1 = vcombine.low %v3017_v61, %v3015_v60  ;;  %v1344_v6 = vor.u32 %v1343_v52, %v1339_v51  ;;  %v2222_v15 = vcombine.low %v1247_v59, %v2960_v57  ;;  %v3043_v18 = vld [vmem:[#allocation2 + $0x30] sm:$0xf] }
  0x55   : > { %1373 = vrot.lane.b32.xlu1 %v1323_v9, %s2598_s15  ;;  %v1415_v9 = vrot.slane %v2221_v53, 1  ;;  %v3032_v13 = vld [vmem:[#allocation2 + $0x34] sm:$0x1]  ;;  %1867 = vmatpush2.bf16.msra.mxu1 %v2475_v58  ;;  %v2476_v20 = vld [vmem:[%s3550_s1 + $0xa0] sm:$0xff]   ;;  %v2150_v24 = vcombine.low %v3020_v4, %v3022_v55  ;;  %v3050_v22 = vld [vmem:[#allocation2 + $0x3c] sm:$0x1] }
  0x56   : > { %632 = vrot.lane.b32.xlu0 %v592_v14, %s2598_s15  ;;  %v3034_v14 = vld [vmem:[#allocation2 + $0x30] sm:$0xf]  ;;  %v3037_v17 = vld [vmem:[#allocation2 + $0x34] sm:$0x1]  ;;  %1868 = vmatprep.subr.bf16.mxu1 %v2596_v0  ;;  %v1272_v28 = vld [vmem:[#allocation2 + $0x28] sm:$0xe] }
  0x57   : > { %v3041_v12 = vcombine.low %v3034_v14, %v3032_v13  ;;  %v3054_v57 = vcombine.low %v3043_v18, %v3037_v17  ;;  %v3056_v38 = vld [vmem:[#allocation2 + $0x38] sm:$0xf]  ;;  %v446_v19 = vld [vmem:[#allocation2 + $0x40] sm:$0x1]  ;;  %v477_v34 = vld [vmem:[#allocation2 + $0x44] sm:$0x1]  ;;  %v2246_v0 = vcombine.low %v1272_v28, %v2995_v43  ;;  %v2164_v43 = vcombine.low %v2915_v21, %v2915_v21 }
  0x58   : > { %v3061_v31 = vcombine.low %v3056_v38, %v3050_v22  ;;  %v839_v36 = vrot.slane %v2181_v10, 1  ;;  %v601_v40 = vshrl.u32 %v2150_v24, 16  ;;  %v3065_v35 = vld [vmem:[#allocation2 + $0x28] sm:$0xf]  ;;  %v3067_v47 = vld [vmem:[#allocation2 + $0x2c] sm:$0x1]  ;;  %v2229_v21 = vcombine.low %v2926_v26, %v2926_v26 }
  0x59   : > { %1375 = vrot.lane.b32.xlu1 %v1330_v8, %s2598_s15  ;;  %v1583_v8 = vrot.slane %v2245_v11, 1  ;;  %1869 = vmatpush2.bf16.msra.mxu1 %v2476_v20  ;;  %v603_v37 = vshll.u32 %v2150_v24, 16  ;;  %v447_v29 = vsel %vm2701_vm4, 0, %v446_v19  ;;  %v3076_v51 = vld [vmem:[#allocation2 + $0x2c] sm:$0x1]  ;;  %v2215_v52 = vcombine.low %v3065_v35, %v3067_v47 }
  0x5a   : > { %1377 = vrot.lane.b32.xlu0 %v1337_v39, %s2598_s15  ;;  %v1416_v39 = vrot.slane %v2222_v15, 1  ;;  %448 = vst [vmem:[#allocation2 + $0x40] sm:$0x1] %v447_v29  ;;  %v3084_v53 = vld [vmem:[#allocation2 + $0x3c] sm:$0x1]  ;;  %v1584_v54 = vrot.slane %v2246_v0, 1  ;;  %v2165_v24 = vcombine.low %v2937_v33, %v2937_v33 }
  0x5b   : > { %v3086_v3 = vld [vmem:[#allocation2 + $0x38] sm:$0xf]  ;;  %v605_v56 = vrot.slane %v603_v37, 1  ;;  %v504_v58 = vld [vmem:[#allocation2 + $0x20] sm:$0xe]  ;;  %v1348_v10 = vshll.u32 %v2215_v52, 16 }
  0x5c   : > { %v3090_v59 = vcombine.low %v3086_v3, %v3084_v53  ;;  %v3100_v15 = vld [vmem:[#allocation2 + $0x34] sm:$0x1]  ;;  %v1346_v19 = vshrl.u32 %v2215_v52, 16  ;;  %v528_v29 = vld [vmem:[#allocation2 + $0x28] sm:$0xe] }
  0x5d   : > { %634 = vrot.lane.b32.xlu1 %v599_v50, %s2598_s15  ;;  %v3074_v50 = vld [vmem:[#allocation2 + $0x28] sm:$0xf]  ;;  %v606_v28 = vor.u32 %v605_v56, %v601_v40 }
  0x5e   : > { %848 = vrot.lane.b32.xlu0 %v838_v48, %s2598_s15  ;;  %v478_v48 = vsel %vm2707_vm5, 0, %v477_v34  ;;  %v2151_v11 = vcombine.low %v3074_v50, %v3076_v51  ;;  %v2158_v34 = vcombine.low %v504_v58, %v3022_v55  ;;  %v3131_v58 = vld [vmem:[#allocation2 + $0x4c] sm:$0x1] }
  0x5f   : > { %479 = vst [vmem:[#allocation2 + $0x44] sm:$0x1] %v478_v48 }
  0x60   : > { %v608_v0 = vshrl.u32 %v2151_v11, 16  ;;  %v672_v37 = vrot.slane %v2158_v34, 1 }
  0x61   : > { %1379 = vrot.lane.b32.xlu1 %v1344_v6, %s2598_s15  ;;  %v449_v6 = vld [vmem:[#allocation2 + $0x48] sm:$0x1]  ;;  %v3109_v26 = vld [vmem:[#allocation2 + $0x40] sm:$0xf] }
  0x62   : > { %1425 = vrot.lane.b32.xlu0 %v1415_v9, %s2597_s9  ;;  %v3092_v9 = vld [vmem:[#allocation2 + $0x30] sm:$0xf]  ;;  %v450_v20 = vsel %vm2701_vm4, 0, %v449_v6  ;;  %v3121_v55 = vld [vmem:[#allocation2 + $0x40] sm:$0xf] }
  0x63   : > { %451 = vst [vmem:[#allocation2 + $0x48] sm:$0x1] %v450_v20  ;;  %v2216_v2 = vcombine.low %v3092_v9, %v3100_v15 }
  0x65   : > { %850 = vrot.lane.b32.xlu1 %v839_v36, %s2598_s15  ;;  %v1355_v56 = vshll.u32 %v2216_v2, 16 }
  0x66   : > { %1593 = vrot.lane.b32.xlu0 %v1583_v8, %s2598_s15  ;;  %v3107_v36 = vld [vmem:[#allocation2 + $0x44] sm:$0x1]  ;;  %v1350_v8 = vrot.slane %v1348_v10, 1 }
  0x67   : > { %v3117_v33 = vcombine.low %v3109_v26, %v3107_v36  ;;  %v3119_v40 = vld [vmem:[#allocation2 + $0x44] sm:$0x1]  ;;  %v1357_v20 = vrot.slane %v1355_v56, 1 }
  0x68   : > { %v3125_v48 = vcombine.low %v3121_v55, %v3119_v40  ;;  %v1351_v52 = vor.u32 %v1350_v8, %v1346_v19 }
  0x69   : > { %1427 = vrot.lane.b32.xlu1 %v1416_v39, %s2597_s9  ;;  %v610_v39 = vshll.u32 %v2151_v11, 16  ;;  %v1353_v11 = vshrl.u32 %v2216_v2, 16 }
  0x6a   : > { %720 = vrot.lane.b32.xlu0 %v2164_v43, %s2599_s25  ;;  %v2230_v43 = vcombine.low %v2997_v45, %v2997_v45  ;;  %v3133_v6 = vld [vmem:[#allocation2 + $0x48] sm:$0xf]  ;;  %v2182_v45 = vcombine.low %v528_v29, %v3015_v60 }
  0x6b   : > { %v1358_v19 = vor.u32 %v1357_v20, %v1353_v11  ;;  %v3156_v20 = vld [vmem:[#allocation2 + $0x38] sm:$0xf] }
  0x6c   : > { %v840_v34 = vrot.slane %v2182_v45, 1  ;;  %v2166_v45 = vcombine.low %v3017_v61, %v3017_v61  ;;  %v3171_v61 = vld [vmem:[#allocation2 + $0x40] sm:$0xf] }
  0x6d   : > { %1595 = vrot.lane.b32.xlu1 %v1584_v54, %s2598_s15  ;;  %v612_v54 = vrot.slane %v610_v39, 1 }
  0x6e   : > { %1465 = vrot.lane.b32.xlu0 %v2229_v21, %s2599_s25  ;;  %v3137_v21 = vcombine.low %v3133_v6, %v3131_v58 }
  0x6f   : > { %v613_v10 = vor.u32 %v612_v54, %v608_v0  ;;  %v498_v54 = vld [vmem:[#allocation2 + $0x34] sm:$0x1] }
  0x70   : > { %3564 = vst [vmem:[#allocation10_spill] sm:$0xff] %v3137_v21  ;;  %v1273_v21 = vld [vmem:[#allocation2 + $0x30] sm:$0xe] }
  0x71   : > { %722 = vrot.lane.b32.xlu1 %v2165_v24, %s2599_s25  ;;  %v505_v24 = vld [vmem:[#allocation2 + $0x28] sm:$0xe]  ;;  %v2247_v29 = vcombine.low %v1273_v21, %v3032_v13 }
  0x72   : > { %636 = vrot.lane.b32.xlu0 %v606_v28, %s2598_s15  ;;  %v1248_v28 = vld [vmem:[#allocation2 + $0x28] sm:$0xe]  ;;  %v2159_v8 = vcombine.low %v505_v24, %v3076_v51 }
  0x73   : > { %v2223_v39 = vcombine.low %v1248_v28, %v3067_v47  ;;  %v1585_v51 = vrot.slane %v2247_v29, 1 }
  0x74   : > { %v673_v2 = vrot.slane %v2159_v8, 1  ;;  %v2231_v8 = vcombine.low %v3034_v14, %v3034_v14 }
  0x75   : > { %1467 = vrot.lane.b32.xlu1 %v2230_v43, %s2599_s25  ;;  %v529_v43 = vld [vmem:[#allocation2 + $0x30] sm:$0xe]  ;;  %v1417_v60 = vrot.slane %v2223_v39, 1 }
  0x76   : > { %1381 = vrot.lane.b32.xlu0 %v1351_v52, %s2598_s15  ;;  %v2183_v0 = vcombine.low %v529_v43, %v3037_v17  ;;  %v1249_v52 = vld [vmem:[#allocation2 + $0x30] sm:$0xe]  ;;  %v1242_v17 = vld [vmem:[#allocation2 + $0x3c] sm:$0x1] }
  0x77   : > { %v2224_v56 = vcombine.low %v1249_v52, %v3100_v15  ;;  %v2217_v28 = vcombine.low %v3156_v20, %v1242_v17  ;;  %v3164_v15 = vld [vmem:[#allocation2 + $0x38] sm:$0xf] }
  0x78   : > { %v841_v47 = vrot.slane %v2183_v0, 1  ;;  %v2167_v0 = vcombine.low %v3043_v18, %v3043_v18 }
  0x79   : > { %638 = vrot.lane.b32.xlu1 %v613_v10, %s2598_s15  ;;  %v1274_v10 = vld [vmem:[#allocation2 + $0x38] sm:$0xe]  ;;  %v1418_v21 = vrot.slane %v2224_v56, 1  ;;  %v1362_v43 = vshll.u32 %v2217_v28, 16  ;;  %v1360_v29 = vshrl.u32 %v2217_v28, 16 }
  0x7a   : > { %684 = vrot.lane.b32.xlu0 %v672_v37, %s2597_s9  ;;  %v3150_v37 = vld [vmem:[#allocation2 + $0x30] sm:$0xf]  ;;  %v2248_v13 = vcombine.low %v1274_v10, %v3050_v22  ;;  %v2232_v10 = vcombine.low %v3056_v38, %v3056_v38 }
  0x7b   : > { %v2152_v11 = vcombine.low %v3150_v37, %v498_v54  ;;  %v1364_v52 = vrot.slane %v1362_v43, 1 }
  0x7d   : > { %1383 = vrot.lane.b32.xlu1 %v1358_v19, %s2598_s15  ;;  %v617_v24 = vshll.u32 %v2152_v11, 16  ;;  %v499_v19 = vld [vmem:[#allocation2 + $0x3c] sm:$0x1]  ;;  %v615_v22 = vshrl.u32 %v2152_v11, 16  ;;  %v1365_v18 = vor.u32 %v1364_v52, %v1360_v29  ;;  %v1275_v52 = vld [vmem:[#allocation2 + $0x40] sm:$0xe] }
  0x7e   : > { %852 = vrot.lane.b32.xlu0 %v840_v34, %s2598_s15  ;;  %v1586_v34 = vrot.slane %v2248_v13, 1 }
  0x7f   : > { %v619_v39 = vrot.slane %v617_v24, 1  ;;  %v530_v24 = vld [vmem:[#allocation2 + $0x38] sm:$0xe] }
  0x80   : > { %v2184_v38 = vcombine.low %v530_v24, %v3084_v53 }
  0x81   : > { %686 = vrot.lane.b32.xlu1 %v673_v2, %s2597_s9  ;;  %v2153_v2 = vcombine.low %v3164_v15, %v499_v19  ;;  %v620_v14 = vor.u32 %v619_v39, %v615_v22  ;;  %v1250_v39 = vld [vmem:[#allocation2 + $0x38] sm:$0xe] }
  0x82   : > { %1429 = vrot.lane.b32.xlu0 %v1417_v60, %s2597_s9  ;;  %v1243_v60 = vld [vmem:[#allocation2 + $0x44] sm:$0x1]  ;;  %v2225_v29 = vcombine.low %v1250_v39, %v1242_v17 }
  0x83   : > { %v2218_v56 = vcombine.low %v3171_v61, %v1243_v60  ;;  %v622_v13 = vshrl.u32 %v2153_v2, 16 }
  0x85   : > { %854 = vrot.lane.b32.xlu1 %v841_v47, %s2598_s15  ;;  %v624_v47 = vshll.u32 %v2153_v2, 16  ;;  %v842_v2 = vrot.slane %v2184_v38, 1 }
  0x86   : > { %1597 = vrot.lane.b32.xlu0 %v1585_v51, %s2598_s15  ;;  %v506_v51 = vld [vmem:[#allocation2 + $0x30] sm:$0xe] }
  0x87   : > { %v2160_v11 = vcombine.low %v506_v51, %v498_v54  ;;  %v507_v54 = vld [vmem:[#allocation2 + $0x38] sm:$0xe]  ;;  %v1419_v51 = vrot.slane %v2225_v29, 1 }
  0x89   : > { %1431 = vrot.lane.b32.xlu1 %v1418_v21, %s2597_s9  ;;  %v626_v21 = vrot.slane %v624_v47, 1  ;;  %v674_v28 = vrot.slane %v2160_v11, 1 }
  0x8a   : > { %724 = vrot.lane.b32.xlu0 %v2166_v45, %s2599_s25  ;;  %v1369_v45 = vshll.u32 %v2218_v56, 16 }
  0x8c   : > { %v1371_v22 = vrot.slane %v1369_v45, 1 }
  0x8d   : > { %1599 = vrot.lane.b32.xlu1 %v1586_v34, %s2598_s15  ;;  %v627_v34 = vor.u32 %v626_v21, %v622_v13  ;;  %v1276_v13 = vld [vmem:[#allocation2 + $0x48] sm:$0xe] }
  0x8e   : > { %1469 = vrot.lane.b32.xlu0 %v2231_v8, %s2599_s25  ;;  %v1367_v8 = vshrl.u32 %v2218_v56, 16  ;;  %v2249_v56 = vcombine.low %v1275_v52, %v3107_v36  ;;  %v2168_v36 = vcombine.low %v3086_v3, %v3086_v3  ;;  %v2169_v3 = vcombine.low %v3121_v55, %v3121_v55 }
  0x8f   : > { %v1511_v55 = vshll.u32 %v2844_v30, 16 }
  0x90   : > { %v1372_v43 = vor.u32 %v1371_v22, %v1367_v8  ;;  %v766_v22 = vshll.u32 %v2828_v5, 16 }
  0x91   : > { %726 = vrot.lane.b32.xlu1 %v2167_v0, %s2599_s25  ;;  %v2161_v0 = vcombine.low %v507_v54, %v499_v19  ;;  %v1587_v19 = vrot.slane %v2249_v56, 1 }
  0x92   : > { %640 = vrot.lane.b32.xlu0 %v620_v14, %s2598_s15  ;;  %v531_v14 = vld [vmem:[#allocation2 + $0x40] sm:$0xe] }
  0x93   : > { %v675_v47 = vrot.slane %v2161_v0, 1  ;;  %v2185_v53 = vcombine.low %v531_v14, %v3119_v40  ;;  %v2250_v40 = vcombine.low %v1276_v13, %v3131_v58  ;;  %v757_v58 = vshrl.u32 %v2832_v16, 16 }
  0x94   : > { %v1504_v0 = vshll.u32 %v2837_v23, 16 }
  0x95   : > { %1471 = vrot.lane.b32.xlu1 %v2232_v10, %s2599_s25  ;;  %v1251_v10 = vld [vmem:[#allocation2 + $0x40] sm:$0xe]  ;;  %v843_v17 = vrot.slane %v2185_v53, 1  ;;  %v1588_v24 = vrot.slane %v2250_v40, 1 }
  0x96   : > { %1385 = vrot.lane.b32.xlu0 %v1365_v18, %s2598_s15  ;;  %v2226_v18 = vcombine.low %v1251_v10, %v1243_v60  ;;  %v2233_v60 = vcombine.low %v3109_v26, %v3109_v26  ;;  %v764_v26 = vshrl.u32 %v2828_v5, 16  ;;  %v1502_v5 = vshrl.u32 %v2837_v23, 16 }
  0x97   : > { %v1509_v10 = vshrl.u32 %v2844_v30, 16 }
  0x98   : > { %v1420_v45 = vrot.slane %v2226_v18, 1 }
  0x99   : > { %642 = vrot.lane.b32.xlu1 %v627_v34, %s2598_s15 }
  0x9a   : > { %688 = vrot.lane.b32.xlu0 %v674_v28, %s2597_s9  ;;  %v759_v28 = vshll.u32 %v2832_v16, 16 }
  0x9c   : > { %v761_v38 = vrot.slane %v759_v28, 1 }
  0x9d   : > { %1387 = vrot.lane.b32.xlu1 %v1372_v43, %s2598_s15  ;;  %v768_v43 = vrot.slane %v766_v22, 1 }
  0x9e   : > { %856 = vrot.lane.b32.xlu0 %v842_v2, %s2598_s15  ;;  %v3191_v11 = vpop.permute.xlu0 %676  ;;  %v2234_v2 = vcombine.low %v3133_v6, %v3133_v6  ;;  %v762_v29 = vor.u32 %v761_v38, %v757_v58 }
  0xa1   : > { %690 = vrot.lane.b32.xlu1 %v675_v47, %s2597_s9  ;;  %v769_v47 = vor.u32 %v768_v43, %v764_v26 }
  0xa2   : > { %1433 = vrot.lane.b32.xlu0 %v1419_v51, %s2597_s9  ;;  %v629_v21 = vpop.permute.xlu0 %628  ;;  %v1506_v51 = vrot.slane %v1504_v0, 1 }
  0xa4   : > { %v1507_v18 = vor.u32 %v1506_v51, %v1502_v5 }
  0xa5   : > { %858 = vrot.lane.b32.xlu1 %v843_v17, %s2598_s15  ;;  %v1513_v17 = vrot.slane %v1511_v55, 1  ;;  %v773_v55 = vshll.u32 %v2924_v25, 16 }
  0xa6   : > { %1601 = vrot.lane.b32.xlu0 %v1587_v19, %s2598_s15 }
  0xa7   : > { %v775_v51 = vrot.slane %v773_v55, 1 }
  0xa9   : > { %1435 = vrot.lane.b32.xlu1 %v1420_v45, %s2597_s9  ;;  %s3336_s9 = sand.u32 1, %s2586_s19  }
  0xaa   : > { %728 = vrot.lane.b32.xlu0 %v2168_v36, %s2599_s25  ;;  %v1514_v36 = vor.u32 %v1513_v17, %v1509_v10  ;;  %s1969_s17 = scalar_lea.sflag [#allocation4], %s3336_s9 }
  0xab   : > { %v719_v34 = vpop.permute.xlu1 %718 }
  0xac   : > { %v717_v8 = vpop.permute.xlu0 %716 }
  0xad   : > { %1603 = vrot.lane.b32.xlu1 %v1588_v24, %s2598_s15  ;;  %s2135_s15 = sshll.u32 %s3336_s9, 7 }
  0xae   : > { %1473 = vrot.lane.b32.xlu0 %v2233_v60, %s2599_s25  ;;  %v2477_v60 = vld [vmem:[#allocation2] sm:$0xf]  ;;  %s3345_s8 = scalar_lea.vmem [#allocation3], %s2135_s15 }
  0xaf   : > { %v1464_v54 = vpop.permute.xlu1 %1463  ;;  %v863_v28 = vsel %vm860_vm7, %v2477_v60, %v629_v21  ;;  %s1990_s12 = sshll.u32 %s3345_s8, 4  ;;  %s3426_s12 = int_to_ptr.vmem [resolvable:$true] %s1990_s12 }
  0xb0   : > { %v1462_v39 = vpop.permute.xlu0 %1461  ;;  %s2478_s26 = scalar_lea.vmem %s3426_s12, 2048  ;;  %p2485_p0 = scmp.lt.s32.totalorder %s3426_s12, %s2483_s6 }
  0xb1   : > { %730 = vrot.lane.b32.xlu1 %v2169_v3, %s2599_s25  ;;  %v887_v3 = vsel %vm885_vm8, %v863_v28, %v3191_v11  ;;  %v1523_v28 = vshrl.u32 %v3001_v7, 16  ;;  %p2479_p11 = scmp.ne.s32.totalorder %s3426_s12, %s2478_s26  ;;  %p2486_p1 = scmp.lt.s32.totalorder %s2484_s7, %s2478_s26 }
  0xb3   : > { %v679_v14 = vpop.permute.xlu1 %678  ;;  %p2480_p12 = pnand %p2479_p11, %p2675_p5  ;;  %p2487_p2 = por %p2486_p1, %p2485_p0 }
  0xb4   : > { %v845_v52 = vpop.permute.xlu0 %844 }
  0xb5   : > { %1475 = vrot.lane.b32.xlu1 %v2234_v2, %s2599_s25  ;;  %v921_v16 = vsel %vm860_vm7, %v762_v29, %v845_v52  ;;  %v904_v2 = vsel %vm902_vm9, %v887_v3, %v717_v8  ;;  %p2481_p13 = pneg %p2480_p12 }
  0xb7   : > { %v847_v53 = vpop.permute.xlu1 %846  ;;  %p2488_p3 = pnand %p2487_p2, %p2481_p13 }
  0xb8   : > { %v1422_v56 = vpop.permute.xlu0 %1421  ;;  %v924_v6 = vsel %vm860_vm7, %v769_v47, %v847_v53 }
  0xb9   : > { %v2188_v19 = vcombine.low %v921_v16, %v924_v6 }
  0xbb   : > { %v1424_v13 = vpop.permute.xlu1 %1423  ;;  %2207 = vmatprep.mubr.msk.bf16.mxu0 %vm885_vm8, %v2188_v19 }
  0xbc   : > { %v1590_v45 = vpop.permute.xlu0 %1589 }
  0xbd   : > { %v1663_v40 = vsel %vm860_vm7, %v1507_v18, %v1590_v45  ;;  %v1518_v18 = vshll.u32 %v2935_v32, 16 }
  0xbf   : > { %v1592_v24 = vpop.permute.xlu1 %1591 }
  0xc0   : > { %v3224_v23 = vpop.permute.xlu0 %680  ;;  %v1666_v22 = vsel %vm860_vm7, %v1514_v36, %v1592_v24 }
  0xc1   : > { %v2276_v30 = vcombine.low %v1663_v40, %v1666_v22  ;;  %v1516_v40 = vshrl.u32 %v2935_v32, 16 }
  0xc3   : > { %v683_v58 = vpop.permute.xlu1 %682  ;;  %2295 = vmatprep.mubr.msk.bf16.mxu1 %vm885_vm8, %v2276_v30 }
  0xc4   : > { %v631_v38 = vpop.permute.xlu0 %630 }
  0xc5   : > { %v866_v26 = vsel %vm860_vm7, %v2842_v27, %v631_v38  ;;  %v780_v27 = vshll.u32 %v2948_v42, 16 }
  0xc6   : > { %v889_v43 = vsel %vm885_vm8, %v866_v26, %v679_v14  ;;  %v771_v14 = vshrl.u32 %v2924_v25, 16 }
  0xc7   : > { %v906_v21 = vsel %vm902_vm9, %v889_v43, %v719_v34  ;;  %v1374_v0 = vpop.permute.xlu1 %1373  ;;  %v782_v19 = vrot.slane %v780_v27, 1 }
  0xc8   : > { %v633_v29 = vpop.permute.xlu0 %632  ;;  %v2187_v52 = vcombine.low %v904_v2, %v906_v21  ;;  %v1607_v11 = vsel %vm860_vm7, %v2864_v44, %v1374_v0  ;;  %v776_v45 = vor.u32 %v775_v51, %v771_v14 }
  0xc9   : > { %v1630_v47 = vsel %vm885_vm8, %v1607_v11, %v1422_v56  ;;  %v778_v56 = vshrl.u32 %v2948_v42, 16  ;;  %v869_v0 = vsel %vm860_vm7, %v2868_v49, %v633_v29 }
  0xca   : > { %1134 = vmatmul.mubr.bf16.vlgmr.msra.gmra.mxu0 %v2187_v52  ;;  %v1646_v53 = vsel %vm902_vm9, %v1630_v47, %v1462_v39  ;;  %v891_v55 = vsel %vm885_vm8, %v869_v0, %v3224_v23 }
  0xcb   : > { %v1376_v16 = vpop.permute.xlu1 %1375  ;;  %v783_v25 = vor.u32 %v782_v19, %v778_v56 }
  0xcc   : > { %v1378_v5 = vpop.permute.xlu0 %1377  ;;  %v1610_v8 = vsel %vm860_vm7, %v2866_v46, %v1376_v16 }
  0xcd   : > { %v1632_v34 = vsel %vm885_vm8, %v1610_v8, %v1424_v13  ;;  %v1525_v13 = vshll.u32 %v3001_v7, 16  ;;  %v1613_v8 = vsel %vm860_vm7, %v2890_v63, %v1378_v5  ;;  %v787_v5 = vshll.u32 %v3026_v1, 16 }
  0xce   : > { %v1648_v44 = vsel %vm902_vm9, %v1632_v34, %v1464_v54  ;;  %v1520_v54 = vrot.slane %v1518_v18, 1 }
  0xcf   : > { %v635_v6 = vpop.permute.xlu1 %634  ;;  %v2275_v17 = vcombine.low %v1646_v53, %v1648_v44  ;;  %v1527_v22 = vrot.slane %v1525_v13, 1  ;;  %v789_v56 = vrot.slane %v787_v5, 1 }
  0xd0   : > { %v849_v10 = vpop.permute.xlu0 %848  ;;  %v1521_v3 = vor.u32 %v1520_v54, %v1516_v40  ;;  %v872_v7 = vsel %vm860_vm7, %v2888_v62, %v635_v6 }
  0xd1   : > { %1871 = vmatmul.mubr.bf16.vlgmr.msra.gmra.mxu1 %v2275_v17  ;;  %v927_v39 = vsel %vm860_vm7, %v776_v45, %v849_v10  ;;  %v1528_v43 = vor.u32 %v1527_v22, %v1523_v28  ;;  %v893_v47 = vsel %vm885_vm8, %v872_v7, %v683_v58  ;;  %v794_v17 = vshll.u32 %v3054_v57, 16 }
  0xd2   : > { %v792_v45 = vshrl.u32 %v3054_v57, 16  ;;  %v1537_v22 = vshrl.u32 %v3061_v31, 16 }
  0xd3   : > { %v1380_v46 = vpop.permute.xlu1 %1379 }
  0xd4   : > { %v1426_v36 = vpop.permute.xlu0 %1425  ;;  %v1616_v34 = vsel %vm860_vm7, %v2944_v41, %v1380_v46  ;;  %v785_v41 = vshrl.u32 %v3026_v1, 16  ;;  %v796_v46 = vrot.slane %v794_v17, 1  ;;  %v806_v17 = vshrl.u32 %v3125_v48, 16 }
  0xd5   : > { %v1634_v14 = vsel %vm885_vm8, %v1613_v8, %v1426_v36  ;;  %v1532_v36 = vshll.u32 %v3041_v12, 16 }
  0xd6   : > { %v790_v13 = vor.u32 %v789_v56, %v785_v41  ;;  %v797_v54 = vor.u32 %v796_v46, %v792_v45  ;;  %v1546_v56 = vshll.u32 %v3117_v33, 16  ;;  %v3565_v46 = vld [vmem:[#allocation10_spill] sm:$0xff] }
  0xd7   : > { %v851_v24 = vpop.permute.xlu1 %850  ;;  %v1534_v28 = vrot.slane %v1532_v36, 1  ;;  %v1553_v36 = vshll.u32 %v3565_v46, 16 }
  0xd8   : > { %v1594_v60 = vpop.permute.xlu0 %1593  ;;  %v930_v42 = vsel %vm860_vm7, %v783_v25, %v851_v24  ;;  %v1530_v24 = vshrl.u32 %v3041_v12, 16 }
  0xd9   : > { %v2190_v30 = vcombine.low %v927_v39, %v930_v42  ;;  %v1669_v2 = vsel %vm860_vm7, %v1521_v3, %v1594_v60  ;;  %v1539_v39 = vshll.u32 %v3061_v31, 16 }
  0xdb   : > { %v1428_v38 = vpop.permute.xlu1 %1427  ;;  %2208 = vmatprep.mubr.msk.bf16.mxu0 %vm885_vm8, %v2190_v30  ;;  %v1541_v30 = vrot.slane %v1539_v39, 1  ;;  %v1548_v39 = vrot.slane %v1546_v56, 1 }
  0xdc   : > { %v721_v26 = vpop.permute.xlu0 %720  ;;  %v1636_v23 = vsel %vm885_vm8, %v1616_v34, %v1428_v38  ;;  %v1535_v38 = vor.u32 %v1534_v28, %v1530_v24 }
  0xdd   : > { %v908_v49 = vsel %vm902_vm9, %v891_v55, %v721_v26 }
  0xdf   : > { %v1596_v32 = vpop.permute.xlu1 %1595 }
  0xe0   : > { %v1466_v21 = vpop.permute.xlu0 %1465  ;;  %v1672_v52 = vsel %vm860_vm7, %v1528_v43, %v1596_v32 }
  0xe1   : > { %v2278_v11 = vcombine.low %v1669_v2, %v1672_v52  ;;  %v1650_v53 = vsel %vm902_vm9, %v1634_v14, %v1466_v21  ;;  %v1542_v2 = vor.u32 %v1541_v30, %v1537_v22 }
  0xe3   : > { %v723_v16 = vpop.permute.xlu1 %722  ;;  %2296 = vmatprep.mubr.msk.bf16.mxu1 %vm885_vm8, %v2278_v11 }
  0xe4   : > { %v637_v27 = vpop.permute.xlu0 %636  ;;  %v910_v29 = vsel %vm902_vm9, %v893_v47, %v723_v16 }
  0xe5   : > { %v2189_v62 = vcombine.low %v908_v49, %v910_v29  ;;  %v875_v0 = vsel %vm860_vm7, %v3020_v4, %v637_v27 }
  0xe7   : > { %v1468_v58 = vpop.permute.xlu1 %1467  ;;  %1142 = vmatmul.mubr.bf16.gmra.mxu0 %v2189_v62 }
  0xe8   : > { %v1382_v51 = vpop.permute.xlu0 %1381  ;;  %v1652_v44 = vsel %vm902_vm9, %v1636_v23, %v1468_v58 }
  0xe9   : > { %v2277_v63 = vcombine.low %v1650_v53, %v1652_v44  ;;  %v1619_v4 = vsel %vm860_vm7, %v3065_v35, %v1382_v51  ;;  %v801_v44 = vshll.u32 %v3090_v59, 16  ;;  %v808_v51 = vshll.u32 %v3125_v48, 16 }
  0xea   : > { %v1555_v48 = vrot.slane %v1553_v36, 1 }
  0xeb   : > { %v639_v6 = vpop.permute.xlu1 %638  ;;  %1879 = vmatmul.mubr.bf16.gmra.mxu1 %v2277_v63  ;;  %v803_v5 = vrot.slane %v801_v44, 1  ;;  %v810_v41 = vrot.slane %v808_v51, 1 }
  0xec   : > { %v685_v10 = vpop.permute.xlu0 %684  ;;  %v878_v52 = vsel %vm860_vm7, %v3074_v50, %v639_v6 }
  0xed   : > { %v895_v11 = vsel %vm885_vm8, %v875_v0, %v685_v10 }
  0xef   : > { %v1384_v19 = vpop.permute.xlu1 %1383 }
  0xf0   : > { %v853_v18 = vpop.permute.xlu0 %852  ;;  %v1622_v27 = vsel %vm860_vm7, %v3092_v9, %v1384_v19  ;;  %v799_v9 = vshrl.u32 %v3090_v59, 16 }
  0xf1   : > { %v933_v60 = vsel %vm860_vm7, %v790_v13, %v853_v18  ;;  %v811_v13 = vor.u32 %v810_v41, %v806_v17 }
  0xf2   : > { %v804_v19 = vor.u32 %v803_v5, %v799_v9 }
  0xf3   : > { %v687_v25 = vpop.permute.xlu1 %686 }
  0xf4   : > { %v1430_v40 = vpop.permute.xlu0 %1429  ;;  %v897_v55 = vsel %vm885_vm8, %v878_v52, %v687_v25  ;;  %v1544_v25 = vshrl.u32 %v3117_v33, 16 }
  0xf5   : > { %v1638_v50 = vsel %vm885_vm8, %v1619_v4, %v1430_v40 }
  0xf7   : > { %v855_v1 = vpop.permute.xlu1 %854 }
  0xf8   : > { %v1598_v42 = vpop.permute.xlu0 %1597  ;;  %v936_v57 = vsel %vm860_vm7, %v797_v54, %v855_v1  ;;  %v1551_v54 = vshrl.u32 %v3565_v46, 16  ;;  %v1549_v1 = vor.u32 %v1548_v39, %v1544_v25 }
  0xf9   : > { %v2192_v3 = vcombine.low %v933_v60, %v936_v57  ;;  %v1675_v32 = vsel %vm860_vm7, %v1535_v38, %v1598_v42 }
  0xfa   : > { %v1556_v22 = vor.u32 %v1555_v48, %v1551_v54 }
  0xfb   : > { %v1432_v26 = vpop.permute.xlu1 %1431  ;;  %2209 = vmatprep.mubr.msk.bf16.mxu0 %vm885_vm8, %v2192_v3 }
  0xfc   : > { %v725_v43 = vpop.permute.xlu0 %724  ;;  %v1640_v62 = vsel %vm885_vm8, %v1622_v27, %v1432_v26 }
  0xfd   : > { %v912_v8 = vsel %vm902_vm9, %v895_v11, %v725_v43 }
  0xff   : > { %v1600_v12 = vpop.permute.xlu1 %1599 }
 0x100   : > { %v1470_v21 = vpop.permute.xlu0 %1469  ;;  %v1678_v7 = vsel %vm860_vm7, %v1542_v2, %v1600_v12 }
 0x101   : > { %v2280_v31 = vcombine.low %v1675_v32, %v1678_v7  ;;  %v1654_v23 = vsel %vm902_vm9, %v1638_v50, %v1470_v21 }
 0x103   : > { %v727_v47 = vpop.permute.xlu1 %726  ;;  %2297 = vmatprep.mubr.msk.bf16.mxu1 %vm885_vm8, %v2280_v31 }
 0x104   : > { %v641_v16 = vpop.permute.xlu0 %640  ;;  %v914_v49 = vsel %vm902_vm9, %v897_v55, %v727_v47 }
 0x105   : > { %v2191_v29 = vcombine.low %v912_v8, %v914_v49  ;;  %v881_v3 = vsel %vm860_vm7, %v3150_v37, %v641_v16 }
 0x107   : > { %v1472_v34 = vpop.permute.xlu1 %1471  ;;  %1150 = vmatmul.mubr.bf16.gmra.mxu0 %v2191_v29 }
 0x108   : > { %v1386_v14 = vpop.permute.xlu0 %1385  ;;  %v1656_v58 = vsel %vm902_vm9, %v1640_v62, %v1472_v34 }
 0x109   : > { %v2279_v53 = vcombine.low %v1654_v23, %v1656_v58  ;;  %v1625_v31 = vsel %vm860_vm7, %v3156_v20, %v1386_v14  ;;  %v3342_v20 = vld [vmem:[%s3551_s2] ss:$0 sm:$0xff] }
 0x10b   : > { %v643_v63 = vpop.permute.xlu1 %642  ;;  %1887 = vmatmul.mubr.bf16.gmra.mxu1 %v2279_v53 }
 0x10c   : > { %v689_v35 = vpop.permute.xlu0 %688  ;;  %v884_v43 = vsel %vm860_vm7, %v3164_v15, %v643_v63 }
 0x10d   : > { %v899_v2 = vsel %vm885_vm8, %v881_v3, %v689_v35 }
 0x10f   : > { %v1388_v6 = vpop.permute.xlu1 %1387 }
 0x110   : > { %v857_v10 = vpop.permute.xlu0 %856  ;;  %v1628_v15 = vsel %vm860_vm7, %v3171_v61, %v1388_v6 }
 0x111   : > { %v939_v40 = vsel %vm860_vm7, %v804_v19, %v857_v10 }
 0x113   : > { %v691_v18 = vpop.permute.xlu1 %690 }
 0x114   : > { %v1434_v45 = vpop.permute.xlu0 %1433  ;;  %v901_v32 = vsel %vm885_vm8, %v884_v43, %v691_v18 }
 0x115   : > { %v1642_v52 = vsel %vm885_vm8, %v1625_v31, %v1434_v45 }
 0x117   : > { %v859_v59 = vpop.permute.xlu1 %858 }
 0x118   : > { %v942_v24 = vsel %vm860_vm7, %v811_v13, %v859_v59  ;;  %v1602_v28 = vpop.permute.xlu0 %1601 }
 0x119   : > { %v2194_v60 = vcombine.low %v939_v40, %v942_v24  ;;  %v1681_v57 = vsel %vm860_vm7, %v1549_v1, %v1602_v28 }
 0x11b   : > { %v1436_v42 = vpop.permute.xlu1 %1435  ;;  %2210 = vmatprep.mubr.msk.bf16.mxu0 %vm885_vm8, %v2194_v60 }
 0x11c   : > { %v729_v30 = vpop.permute.xlu0 %728  ;;  %v1644_v11 = vsel %vm885_vm8, %v1628_v15, %v1436_v42 }
 0x11d   : > { %v916_v21 = vsel %vm902_vm9, %v899_v2, %v729_v30 }
 0x11f   : > { %v1604_v33 = vpop.permute.xlu1 %1603 }
 0x120   : > { %v1684_v38 = vsel %vm860_vm7, %v1556_v22, %v1604_v33  ;;  %v1474_v7 = vpop.permute.xlu0 %1473 }
 0x121   : > { %v2282_v26 = vcombine.low %v1681_v57, %v1684_v38  ;;  %v1658_v47 = vsel %vm902_vm9, %v1642_v52, %v1474_v7 }
 0x123   : > { %v731_v12 = vpop.permute.xlu1 %730  ;;  %2298 = vmatprep.mubr.msk.bf16.mxu1 %vm885_vm8, %v2282_v26 }
 0x124   : > { %v918_v0 = vsel %vm902_vm9, %v901_v32, %v731_v12 }
 0x125   : > { %v2193_v37 = vcombine.low %v916_v21, %v918_v0 }
 0x127   : > { %v1476_v55 = vpop.permute.xlu1 %1475  ;;  %1158 = vmatmul.mubr.bf16.gmra.mxu0 %v2193_v37 }
 0x128   : > { %v1660_v16 = vsel %vm902_vm9, %v1644_v11, %v1476_v55 }
 0x129   : > { %v2281_v8 = vcombine.low %v1658_v47, %v1660_v16 }
 0x12b   : > { %1895 = vmatmul.mubr.bf16.gmra.mxu1 %v2281_v8 }
 0x18a   : > { %v1135_v61 = vpop.f32.mrf.mxu0 }
 0x18b   : > { %v1136_v49 = vadd.f32 %v3342_v20, %v1135_v61 }
 0x18c   : > { %v1137_v29 = vpop.f32.mrf.mxu0 }
 0x18d   : > { %1166 = vst.msk [vmem:[%s3345_s8] sm:$0xff] %vm860_vm7, %v1136_v49  ;;  %v1196_v27 = vmul.f32 %v1136_v49, %v1136_v49  ;;  %v1174_v34 = vsel %vm860_vm7, %v1136_v49, 0.0 }
 0x18e   : > { %v1138_v4 = vpop.f32.mrf.mxu0 }
 0x18f   : > { %v1139_v50 = vadd.f32 %v3342_v20, %v1138_v4  ;;  %v1204_v44 = vsel %vm860_vm7, %v1196_v27, 0.0 }
 0x190   : > { %v1140_v62 = vpop.f32.mrf.mxu0 }
 0x191   : > { %1167 = vst.msk [vmem:[%s3345_s8 + $0x10] sm:$0xff] %vm860_vm7, %v1139_v50  ;;  %v1175_v14 = vsel %vm860_vm7, %v1139_v50, 0.0  ;;  %v1197_v23 = vmul.f32 %v1139_v50, %v1139_v50  ;;  %v1872_v53 = vpop.f32.mrf.mxu1 }
 0x192   : > { %v1176_v58 = vadd.f32 %v1175_v14, %v1174_v34  ;;  %v1873_v35 = vadd.f32 %v3342_v20, %v1872_v53 }
 0x193   : > { %v1205_v63 = vsel %vm860_vm7, %v1197_v23, 0.0  ;;  %v1874_v9 = vpop.f32.mrf.mxu1 }
 0x194   : > { %v1206_v51 = vadd.f32 %v1205_v63, %v1204_v44  ;;  %2299 = vst.msk [vmem:[%s3345_s8 + $0x8] sm:$0xff] %vm860_vm7, %v1873_v35  ;;  %v1934_v6 = vmul.f32 %v1873_v35, %v1873_v35  ;;  %v1912_v41 = vsel %vm860_vm7, %v1873_v35, 0.0 }
 0x195   : > { %v1875_v5 = vpop.f32.mrf.mxu1 }
 0x196   : > { %v1876_v10 = vadd.f32 %v3342_v20, %v1875_v5  ;;  %v1942_v45 = vsel %vm860_vm7, %v1934_v6, 0.0 }
 0x197   : > { %v1877_v17 = vpop.f32.mrf.mxu1 }
 0x198   : > { %2300 = vst.msk [vmem:[%s3345_s8 + $0x18] sm:$0xff] %vm860_vm7, %v1876_v10  ;;  %v1913_v56 = vsel %vm860_vm7, %v1876_v10, 0.0  ;;  %v1935_v19 = vmul.f32 %v1876_v10, %v1876_v10 }
 0x199   : > { %v1914_v18 = vadd.f32 %v1913_v56, %v1912_v41 }
 0x19a   : > { %v1943_v46 = vsel %vm860_vm7, %v1935_v19, 0.0 }
 0x19b   : > { %v1944_v36 = vadd.f32 %v1943_v46, %v1942_v45 }
 0x1a7   : > { %v1143_v13 = vpop.f32.mrf.mxu0 }
 0x1a8   : > { %v1144_v25 = vadd.f32 %v3342_v20, %v1143_v13 }
 0x1a9   : > { %v1145_v40 = vpop.f32.mrf.mxu0 }
 0x1aa   : > { %1168 = vst.msk [vmem:[%s3345_s8 + $0x20] sm:$0xff] %vm860_vm7, %v1144_v25  ;;  %v1198_v0 = vmul.f32 %v1144_v25, %v1144_v25  ;;  %v1177_v37 = vsel %vm860_vm7, %v1144_v25, 0.0 }
 0x1ab   : > { %v1146_v39 = vpop.f32.mrf.mxu0  ;;  %v1880_v59 = vpop.f32.mrf.mxu1  ;;  %v1178_v8 = vadd.f32 %v1177_v37, %v1176_v58 }
 0x1ac   : > { %v1147_v54 = vadd.f32 %v3342_v20, %v1146_v39  ;;  %v1881_v24 = vadd.f32 %v3342_v20, %v1880_v59  ;;  %v1207_v31 = vsel %vm860_vm7, %v1198_v0, 0.0 }
 0x1ad   : > { %v1148_v48 = vpop.f32.mrf.mxu0  ;;  %v1882_v60 = vpop.f32.mrf.mxu1  ;;  %v1208_v61 = vadd.f32 %v1207_v31, %v1206_v51 }
 0x1ae   : > { %1169 = vst.msk [vmem:[%s3345_s8 + $0x30] sm:$0xff] %vm860_vm7, %v1147_v54  ;;  %2301 = vst.msk [vmem:[%s3345_s8 + $0x28] sm:$0xff] %vm860_vm7, %v1881_v24  ;;  %v1199_v7 = vmul.f32 %v1147_v54, %v1147_v54  ;;  %v1936_v15 = vmul.f32 %v1881_v24, %v1881_v24  ;;  %v1179_v52 = vsel %vm860_vm7, %v1147_v54, 0.0  ;;  %v1915_v55 = vsel %vm860_vm7, %v1881_v24, 0.0 }
 0x1af   : > { %v1883_v28 = vpop.f32.mrf.mxu1  ;;  %v1180_v50 = vadd.f32 %v1179_v52, %v1178_v8  ;;  %v1916_v34 = vadd.f32 %v1915_v55, %v1914_v18 }
 0x1b0   : > { %v1884_v1 = vadd.f32 %v3342_v20, %v1883_v28  ;;  %v1209_v11 = vsel %vm860_vm7, %v1199_v7, 0.0  ;;  %v1945_v49 = vsel %vm860_vm7, %v1936_v15, 0.0 }
 0x1b1   : > { %v1885_v42 = vpop.f32.mrf.mxu1  ;;  %v1210_v62 = vadd.f32 %v1209_v11, %v1208_v61  ;;  %v1946_v35 = vadd.f32 %v1945_v49, %v1944_v36 }
 0x1b2   : > { %2302 = vst.msk [vmem:[%s3345_s8 + $0x38] sm:$0xff] %vm860_vm7, %v1884_v1  ;;  %v1937_v47 = vmul.f32 %v1884_v1, %v1884_v1  ;;  %v1917_v29 = vsel %vm860_vm7, %v1884_v1, 0.0 }
 0x1b3   : > { %v1918_v51 = vadd.f32 %v1917_v29, %v1916_v34 }
 0x1b4   : > { %v1947_v53 = vsel %vm860_vm7, %v1937_v47, 0.0 }
 0x1b5   : > { %v1948_v19 = vadd.f32 %v1947_v53, %v1946_v35 }
 0x1c7   : > { %v1151_v22 = vpop.f32.mrf.mxu0 }
 0x1c8   : > { %v1152_v57 = vadd.f32 %v3342_v20, %v1151_v22 }
 0x1c9   : > { %v1153_v30 = vpop.f32.mrf.mxu0 }
 0x1ca   : > { %1170 = vst.msk [vmem:[%s3345_s8 + $0x40] sm:$0xff] %vm860_vm7, %v1152_v57  ;;  %v1200_v16 = vmul.f32 %v1152_v57, %v1152_v57  ;;  %v1181_v4 = vsel %vm860_vm7, %v1152_v57, 0.0 }
 0x1cb   : > { %v1154_v33 = vpop.f32.mrf.mxu0  ;;  %v1888_v3 = vpop.f32.mrf.mxu1  ;;  %v1182_v9 = vadd.f32 %v1181_v4, %v1180_v50 }
 0x1cc   : > { %v1155_v38 = vadd.f32 %v3342_v20, %v1154_v33  ;;  %v1889_v26 = vadd.f32 %v3342_v20, %v1888_v3  ;;  %v1211_v44 = vsel %vm860_vm7, %v1200_v16, 0.0 }
 0x1cd   : > { %v1156_v43 = vpop.f32.mrf.mxu0  ;;  %v1890_v2 = vpop.f32.mrf.mxu1  ;;  %v1212_v18 = vadd.f32 %v1211_v44, %v1210_v62 }
 0x1ce   : > { %1171 = vst.msk [vmem:[%s3345_s8 + $0x50] sm:$0xff] %vm860_vm7, %v1155_v38  ;;  %2303 = vst.msk [vmem:[%s3345_s8 + $0x48] sm:$0xff] %vm860_vm7, %v1889_v26  ;;  %v1201_v27 = vmul.f32 %v1155_v38, %v1155_v38  ;;  %v1938_v14 = vmul.f32 %v1889_v26, %v1889_v26  ;;  %v1183_v58 = vsel %vm860_vm7, %v1155_v38, 0.0  ;;  %v1919_v17 = vsel %vm860_vm7, %v1889_v26, 0.0 }
 0x1cf   : > { %v1891_v32 = vpop.f32.mrf.mxu1  ;;  %v1184_v45 = vadd.f32 %v1183_v58, %v1182_v9  ;;  %v1920_v24 = vadd.f32 %v1919_v17, %v1918_v51 }
 0x1d0   : > { %v1892_v12 = vadd.f32 %v3342_v20, %v1891_v32  ;;  %v1213_v10 = vsel %vm860_vm7, %v1201_v27, 0.0  ;;  %v1949_v46 = vsel %vm860_vm7, %v1938_v14, 0.0 }
 0x1d1   : > { %v1893_v21 = vpop.f32.mrf.mxu1  ;;  %v1214_v54 = vadd.f32 %v1213_v10, %v1212_v18  ;;  %v1950_v33 = vadd.f32 %v1949_v46, %v1948_v19 }
 0x1d2   : > { %2304 = vst.msk [vmem:[%s3345_s8 + $0x58] sm:$0xff] %vm860_vm7, %v1892_v12  ;;  %v1939_v5 = vmul.f32 %v1892_v12, %v1892_v12  ;;  %v1921_v25 = vsel %vm860_vm7, %v1892_v12, 0.0 }
 0x1d3   : > { %v1922_v3 = vadd.f32 %v1921_v25, %v1920_v24 }
 0x1d4   : > { %v1951_v48 = vsel %vm860_vm7, %v1939_v5, 0.0 }
 0x1d5   : > { %v1952_v21 = vadd.f32 %v1951_v48, %v1950_v33 }
 0x1e7   : > { %v1159_v23 = vpop.f32.mrf.mxu0 }
 0x1e8   : > { %v1160_v63 = vadd.f32 %v3342_v20, %v1159_v23 }
 0x1e9   : > { %v1161_v6 = vpop.f32.mrf.mxu0 }
 0x1ea   : > { %1172 = vst.msk [vmem:[%s3345_s8 + $0x60] sm:$0xff] %vm860_vm7, %v1160_v63  ;;  %v1185_v41 = vsel %vm860_vm7, %v1160_v63, 0.0  ;;  %v1202_v56 = vmul.f32 %v1160_v63, %v1160_v63 }
 0x1eb   : > { %v1162_v36 = vpop.f32.mrf.mxu0  ;;  %v1896_v13 = vpop.f32.mrf.mxu1  ;;  %v1186_v60 = vadd.f32 %v1185_v41, %v1184_v45 }
 0x1ec   : > { %v1215_v40 = vsel %vm860_vm7, %v1202_v56, 0.0  ;;  %v1163_v39 = vadd.f32 %v3342_v20, %v1162_v36  ;;  %v1897_v59 = vadd.f32 %v3342_v20, %v1896_v13 }
 0x1ed   : > { %v1164_v28 = vpop.f32.mrf.mxu0  ;;  %v1898_v1 = vpop.f32.mrf.mxu1  ;;  %v1216_v38 = vadd.f32 %v1215_v40, %v1214_v54 }
 0x1ee   : > { %1173 = vst.msk [vmem:[%s3345_s8 + $0x70] sm:$0xff] %vm860_vm7, %v1163_v39  ;;  %v1187_v42 = vsel %vm860_vm7, %v1163_v39, 0.0  ;;  %v1203_v22 = vmul.f32 %v1163_v39, %v1163_v39  ;;  %2305 = vst.msk [vmem:[%s3345_s8 + $0x68] sm:$0xff] %vm860_vm7, %v1897_v59  ;;  %v1923_v57 = vsel %vm860_vm7, %v1897_v59, 0.0  ;;  %v1940_v30 = vmul.f32 %v1897_v59, %v1897_v59 }
 0x1ef   : > { %v1188_v26 = vadd.f32 %v1187_v42, %v1186_v60  ;;  %v1899_v43 = vpop.f32.mrf.mxu1  ;;  %v1924_v37 = vadd.f32 %v1923_v57, %v1922_v3 }
 0x1f0   : > { %v1217_v2 = vsel %vm860_vm7, %v1203_v22, 0.0  ;;  %v1953_v32 = vsel %vm860_vm7, %v1940_v30, 0.0  ;;  %v1900_v12 = vadd.f32 %v3342_v20, %v1899_v43 }
 0x1f1   : > { %v1189_v0 = vsel %vm860_vm7, %v1188_v26, 0.0  ;;  %v1218_v7 = vadd.f32 %v1217_v2, %v1216_v38  ;;  %v1901_v31 = vpop.f32.mrf.mxu1  ;;  %v1954_v47 = vadd.f32 %v1953_v32, %v1952_v21 }
 0x1f2   : > { %v1190_v15 = vrot.slane %v1189_v0, 4  ;;  %2306 = vst.msk [vmem:[%s3345_s8 + $0x78] sm:$0xff] %vm860_vm7, %v1900_v12  ;;  %v1925_v52 = vsel %vm860_vm7, %v1900_v12, 0.0  ;;  %v1941_v11 = vmul.f32 %v1900_v12, %v1900_v12 }
 0x1f3   : > { %v1219_v55 = vsel %vm860_vm7, %v1218_v7, 0.0  ;;  %v1926_v16 = vadd.f32 %v1925_v52, %v1924_v37 }
 0x1f4   : > { %2491 = shalt.err (!%p2488_p3)
}
 0x1f5   : > { %s2492_s15 = scalar_lea.hbm %s3424_s16, 2048  ;;  %s2496_s8 = scalar_lea.hbm %s3552_s3, 4096 }
 0x1f6   : > { %p2493_p4 = scmp.ne.s32.totalorder %s3424_s16, %s2492_s15  ;;  %p2497_p9 = scmp.lt.s32.totalorder %s3424_s16, %s3552_s3 }
 0x1f7   : > { %p2498_p10 = scmp.lt.s32.totalorder %s2496_s8, %s2492_s15 }
 0x1f8   : > { %p2494_p7 = pnand %p2493_p4, %p2675_p5 }
 0x1f9   : > { %p2499_p11 = por %p2498_p10, %p2497_p9 }
 0x1fa   : > { %p2495_p8 = pneg %p2494_p7 }
 0x1fc   : > { %p2500_p12 = pnand %p2499_p11, %p2495_p8 }
 0x1fe   : > { %2503 = shalt.err (!%p2500_p12)
}
 0x1ff   : > { %s2601_s14 = smov 128   ;;  %s2602_s26 = smov 8   ;;  %v1191_v20 = vadd.f32 %v1190_v15, %v1189_v0  ;;  %v1220_v8 = vrot.slane %v1219_v55, 4  ;;  %v1955_v61 = vsel %vm860_vm7, %v1941_v11, 0.0  ;;  %v1927_v49 = vsel %vm860_vm7, %v1926_v16, 0.0 }
 0x200   : > { %2324 = dma.vmem_to_hbm [thread:$0]  (%p2675_p5), %s3426_s12, 2048, %s3424_s16, %s1969_s17, %s2601_s14, %s2601_s14, %s2602_s26   ;;  %v1956_v29 = vadd.f32 %v1955_v61, %v1954_v47  ;;  %v1928_v50 = vrot.slane %v1927_v49, 4 }
 0x201   : > { %v1192_v4 = vrot.slane %v1191_v20, 2  ;;  %v1221_v27 = vadd.f32 %v1220_v8, %v1219_v55  ;;  %s1973_s12 = sand.u32 1, %s2656_s22   ;;  %s2310_s16 = sshll.u32 %s2656_s22, 4 }
 0x202   : > { %v1957_v62 = vsel %vm860_vm7, %v1956_v29, 0.0  ;;  %v1929_v23 = vadd.f32 %v1928_v50, %v1927_v49  ;;  %s227_s17 = scalar_lea.vmem [#allocation5], %s3336_s9  ;;  %s233_s6 = scalar_lea.vmem [#allocation7], %s3336_s9 }
 0x203   : > { %v1193_v34 = vadd.f32 %v1192_v4, %v1191_v20  ;;  %v1222_v14 = vrot.slane %v1221_v27, 2  ;;  %v1958_v53 = vrot.slane %v1957_v62, 4  ;;  %s2006_s30 = sshll.u32 %s227_s17, 4  ;;  %s2019_s7 = sshll.u32 %s233_s6, 4  ;;  %s3473_s30 = int_to_ptr.vmem [resolvable:$true] %s2006_s30  ;;  %s3481_s7 = int_to_ptr.vmem [resolvable:$true] %s2019_s7 }
 0x204   : > { %v1930_v58 = vrot.slane %v1929_v23, 2  ;;  %s3471_s11 = scalar_lea.hbm %s3553_s4, %s2310_s16  ;;  %s3479_s10 = scalar_lea.hbm %s3554_s5, %s2310_s16 }
 0x205   : > { %v1223_v44 = vadd.f32 %v1222_v14, %v1221_v27  ;;  %v1959_v63 = vadd.f32 %v1958_v53, %v1957_v62  ;;  %v1194_v9 = vrot.slane %v1193_v34, 1  ;;  %s3483_s13 = scalar_lea.sflag [#allocation6], %s1973_s12  ;;  %s2504_s14 = scalar_lea.vmem %s3473_s30, 16 }
 0x206   : > { %v1931_v35 = vadd.f32 %v1930_v58, %v1929_v23  ;;  %p2505_p13 = scmp.ne.s32.totalorder %s3473_s30, %s2504_s14  ;;  %s2603_s26 = smov [#allocation5]  }
 0x207   : > { %v1960_v51 = vrot.slane %v1959_v63, 2  ;;  %v1224_v10 = vrot.slane %v1223_v44, 1  ;;  %v1195_v17 = vadd.f32 %v1194_v9, %v1193_v34  ;;  %s2508_s15 = sshll.u32 %s2603_s26, 4  ;;  %s2509_s15 = int_to_ptr.vmem [resolvable:$false] %s2508_s15 }
 0x208   : > { %v1932_v6 = vrot.slane %v1931_v35, 1  ;;  %p2506_p0 = pnand %p2505_p13, %p2675_p5  ;;  %s2510_s25 = scalar_lea.vmem %s2509_s15, 32 }
 0x209   : > { %v1961_v5 = vadd.f32 %v1960_v51, %v1959_v63  ;;  %v1225_v18 = vadd.f32 %v1224_v10, %v1223_v44  ;;  %p2511_p2 = scmp.lt.s32.totalorder %s3473_s30, %s2509_s15  ;;  %p2512_p3 = scmp.lt.s32.totalorder %s2510_s25, %s2504_s14 }
 0x20a   : > { %v1933_v41 = vadd.f32 %v1932_v6, %v1931_v35  ;;  %p2507_p1 = pneg %p2506_p0 }
 0x20b   : > { %v1962_v56 = vrot.slane %v1961_v5, 1  ;;  %p2513_p4 = por %p2512_p3, %p2511_p2 }
 0x20c   : > { %v1964_v19 = vadd.f32 %v1933_v41, %v1195_v17 }
 0x20d   : > { %v1963_v45 = vadd.f32 %v1962_v56, %v1961_v5  ;;  %p2514_p7 = pnand %p2513_p4, %p2507_p1 }
 0x20e   : > { %1966 = vst.msk [vmem:[%s227_s17] sm:$0x1] %vm367_vm1, %v1964_v19 }
 0x20f   : > { %v1965_v46 = vadd.f32 %v1963_v45, %v1225_v18 }
 0x210   : > { %2517 = shalt.err (!%p2514_p7)
}
 0x211   : > { %s2518_s12 = scalar_lea.hbm %s3471_s11, 16  ;;  %s2522_s22 = scalar_lea.hbm %s3553_s4, 32 }
 0x212   : > { %p2519_p8 = scmp.ne.s32.totalorder %s3471_s11, %s2518_s12  ;;  %p2523_p11 = scmp.lt.s32.totalorder %s3471_s11, %s3553_s4 }
 0x213   : > { %p2524_p12 = scmp.lt.s32.totalorder %s2522_s22, %s2518_s12 }
 0x214   : > { %p2520_p9 = pnand %p2519_p8, %p2675_p5 }
 0x215   : > { %p2525_p13 = por %p2524_p12, %p2523_p11 }
 0x216   : > { %p2521_p10 = pneg %p2520_p9 }
 0x218   : > { %p2526_p0 = pnand %p2525_p13, %p2521_p10 }
 0x21a   : > { %2529 = shalt.err (!%p2526_p0)
}
 0x21b   : > { %2325 = dma.vmem_to_hbm [thread:$0]  (%p2675_p5), %s3473_s30, 16, %s3471_s11, %s3483_s13   ;;  %1967 = vst.msk [vmem:[%s233_s6] sm:$0x1] %vm367_vm1, %v1965_v46 }
 0x21c   : > { %s2530_s14 = scalar_lea.vmem %s3481_s7, 16  ;;  %s2604_s15 = smov [#allocation7]  }
 0x21d   : > { %p2531_p1 = scmp.ne.s32.totalorder %s3481_s7, %s2530_s14  ;;  %s2534_s25 = sshll.u32 %s2604_s15, 4  ;;  %s2535_s25 = int_to_ptr.vmem [resolvable:$false] %s2534_s25 }
 0x21e   : > { %s2536_s12 = scalar_lea.vmem %s2535_s25, 32  ;;  %p2537_p4 = scmp.lt.s32.totalorder %s3481_s7, %s2535_s25 }
 0x21f   : > { %p2532_p2 = pnand %p2531_p1, %p2675_p5  ;;  %p2538_p7 = scmp.lt.s32.totalorder %s2536_s12, %s2530_s14 }
 0x221   : > { %p2533_p3 = pneg %p2532_p2  ;;  %p2539_p8 = por %p2538_p7, %p2537_p4 }
 0x223   : > { %p2540_p9 = pnand %p2539_p8, %p2533_p3 }
 0x225   : > { %2543 = shalt.err (!%p2540_p9)
}
 0x226   : > { %s2544_s9 = scalar_lea.hbm %s3479_s10, 16  ;;  %s2548_s11 = scalar_lea.hbm %s3554_s5, 32 }
 0x227   : > { %p2545_p10 = scmp.ne.s32.totalorder %s3479_s10, %s2544_s9  ;;  %p2549_p13 = scmp.lt.s32.totalorder %s3479_s10, %s3554_s5 }
 0x228   : > { %p2550_p0 = scmp.lt.s32.totalorder %s2548_s11, %s2544_s9 }
 0x229   : > { %p2546_p11 = pnand %p2545_p10, %p2675_p5 }
 0x22a   : > { %p2551_p1 = por %p2550_p0, %p2549_p13 }
 0x22b   : > { %p2547_p12 = pneg %p2546_p11 }
 0x22d   : > { %p2552_p2 = pnand %p2551_p1, %p2547_p12 }
 0x22f   : > { %2555 = shalt.err (!%p2552_p2)
}
 0x230   : > { %2326 = dma.vmem_to_hbm [thread:$0]  (%p2675_p5), %s3481_s7, 16, %s3479_s10, %s3483_s13  }
 0x231 PF: > { %p2340_p3 = scmp.ge.s32.totalorder %s2594_s21, 2  ;;  %s2031_s22 = sand.u32 1, %s2582_s18  }
 0x232   : > { %s2032_s8 = scalar_lea.sflag [#allocation4], %s2031_s22 }
 0x233   : > { %p2331_p4 = pnand %p2340_p3, %p2679_p6 }
 0x235   : > { %p2332_p7 = pneg %p2331_p4 }
 0x237   : > { %2573 = dma.done.wait (%p2332_p7), %s2032_s8, 2048  }
 0x238   : > { %2575 = vsyncadd (%p2332_p7), %s2032_s8, 4294965248  ;;  %s2040_s26 = sand.u32 1, %s2131_s23  }
 0x239   : > { %s2041_s28 = scalar_lea.sflag [#allocation6], %s2040_s26 }
 0x23a   : > { %2577 = dma.done.wait (%p2332_p7), %s2041_s28, 32  }
 0x23b   : > { %2579 = vsyncadd (%p2332_p7), %s2041_s28, 4294967264  ;;  %p19_p5 = scmp.ge.s32.totalorder %s2660_s24, 4   ;;  %s3566_s18 = smov %s2586_s19 }
 0x23c   : > { %s3567_s19 = smov %s2590_s20  ;;  %s3568_s20 = smov %s2673_s27 }
 0x23d   : > { %s3569_s21 = smov %s2660_s24  ;;  %21 = sbr.rel (!%p19_p5) target bundleno = 5 (0x5), region = 104 }
 0x242   :  { %2053 = vsyncpa [#allocation4], 1 }
 0x243   :  { %2055 = vsyncpa [#allocation4 + $0x1], 1 }
 0x244   :  { %2056 = vsyncpa [#allocation6], 1 }
 0x245   :  { %2058 = vsyncpa [#allocation6 + $0x1], 1 }

</bundles_post_ra>
